<compile_context>
chip_gen: v6e
topology: v6e:2x2x1
jax: 0.10.0
libtpu: 0.0.40
codegen_flags: <defaults>
</compile_context>

<pallas_src>
import functools

import jax
import jax.numpy as jnp
from jax import lax
from jax.experimental import pallas as pl
from jax.experimental.pallas import tpu as pltpu


def _round_up(x, m):
    return (x + m - 1) // m * m


def _pad2(x, rows, cols):
    r, c = x.shape
    if r == rows and c == cols:
        return x
    return jnp.pad(x, ((0, rows - r), (0, cols - c)))


_VMEM_LIMIT = 32 * 1024 * 1024   # explicit scoped-VMEM limit (v5e default is only 16 MiB)


# ----------------------------------------------------------------------------
# Pallas GEMM kernels (bf16 operands, f32 accumulate, fused bias/residual/ReLU)
# ----------------------------------------------------------------------------
def _gemm_ws_kernel(*refs, has_bias, has_res, do_relu):
    """Weight-stationary: grid over M only, full K x N weight resident in VMEM."""
    a_ref, b_ref = refs[0], refs[1]
    idx = 2
    bias_ref = None
    res_ref = None
    if has_bias:
        bias_ref = refs[idx]; idx += 1
    if has_res:
        res_ref = refs[idx]; idx += 1
    o_ref = refs[idx]

    out = jnp.dot(a_ref[...], b_ref[...], preferred_element_type=jnp.float32)
    if has_bias:
        out = out + bias_ref[...]
    if has_res:
        out = out + res_ref[...].astype(jnp.float32)
    if do_relu:
        out = jnp.maximum(out, 0.0)
    o_ref[...] = out.astype(o_ref.dtype)


def _gemm_tiled_kernel(*refs, has_bias, has_res, do_relu):
    """General (i, j, k) tiled GEMM with f32 accumulator and last-K epilogue."""
    a_ref, b_ref = refs[0], refs[1]
    idx = 2
    bias_ref = None
    res_ref = None
    if has_bias:
        bias_ref = refs[idx]; idx += 1
    if has_res:
        res_ref = refs[idx]; idx += 1
    o_ref = refs[idx]
    acc_ref = refs[idx + 1]

    @pl.when(pl.program_id(2) == 0)
    def _():
        acc_ref[...] = jnp.zeros_like(acc_ref)

    acc_ref[...] += jnp.dot(a_ref[...], b_ref[...],
                            preferred_element_type=jnp.float32)

    @pl.when(pl.program_id(2) == pl.num_programs(2) - 1)
    def _():
        out = acc_ref[...]
        if has_bias:
            out = out + bias_ref[...]
        if has_res:
            out = out + res_ref[...].astype(jnp.float32)
        if do_relu:
            out = jnp.maximum(out, 0.0)
        o_ref[...] = out.astype(o_ref.dtype)


def fused_matmul(a, b, bias=None, residual=None, do_relu=False, out_dtype=None):
    """act(a @ b + bias + residual).  a:[M,K], b:[K,N], bias:[N] f32, residual:[M,N]."""
    M, K = a.shape
    K2, N = b.shape
    assert K == K2
    if out_dtype is None:
        out_dtype = a.dtype
    has_bias = bias is not None
    has_res = residual is not None

    # Skinny / tiny problems: XLA's fused dot beats the Pallas launch + MXU-fill floor.
    if M < 256 or N < 128 or K < 128:
        out = jnp.dot(a, b, preferred_element_type=jnp.float32)
        if has_bias:
            out = out + bias[None, :].astype(jnp.float32)
        if has_res:
            out = out + residual.astype(jnp.float32)
        if do_relu:
            out = jnp.maximum(out, 0.0)
        return out.astype(out_dtype)

    a = a.astype(jnp.bfloat16)
    b = b.astype(jnp.bfloat16)

    Kp128 = _round_up(K, 128)
    Np128 = _round_up(N, 128)
    weight_resident = (Kp128 * Np128 * 2) <= (4 * 1024 * 1024)

    tm = 256
    Mp = _round_up(M, tm)

    if weight_resident:
        Kp, Np = Kp128, Np128
        a_p = _pad2(a, Mp, Kp)
        b_p = _pad2(b, Kp, Np)
        in_specs = [pl.BlockSpec((tm, Kp), lambda i: (i, 0)),
                    pl.BlockSpec((Kp, Np), lambda i: (0, 0))]
        operands = [a_p, b_p]
        if has_bias:
            bias_p = jnp.pad(bias.astype(jnp.float32), (0, Np - N))[None, :]
            in_specs.append(pl.BlockSpec((1, Np), lambda i: (0, 0)))
            operands.append(bias_p)
        if has_res:
            res_p = _pad2(residual.astype(jnp.bfloat16), Mp, Np)
            in_specs.append(pl.BlockSpec((tm, Np), lambda i: (i, 0)))
            operands.append(res_p)
        out = pl.pallas_call(
            functools.partial(_gemm_ws_kernel, has_bias=has_bias,
                              has_res=has_res, do_relu=do_relu),
            out_shape=jax.ShapeDtypeStruct((Mp, Np), out_dtype),
            grid_spec=pltpu.PrefetchScalarGridSpec(
                num_scalar_prefetch=0,
                grid=(Mp // tm,),
                in_specs=in_specs,
                out_specs=pl.BlockSpec((tm, Np), lambda i: (i, 0))),
            compiler_params=pltpu.CompilerParams(
                dimension_semantics=("parallel",),
                vmem_limit_bytes=_VMEM_LIMIT),
        )(*operands)
        return out[:M, :N]

    # Tiled path (weight too large to keep resident).
    tk = min(1024, Kp128)
    tn = 512 if Np128 >= 1024 else min(256, Np128)
    Kp = _round_up(K, tk)
    Np = _round_up(N, tn)
    a_p = _pad2(a, Mp, Kp)
    b_p = _pad2(b, Kp, Np)
    in_specs = [pl.BlockSpec((tm, tk), lambda i, j, k: (i, k)),
                pl.BlockSpec((tk, tn), lambda i, j, k: (k, j))]
    operands = [a_p, b_p]
    if has_bias:
        bias_p = jnp.pad(bias.astype(jnp.float32), (0, Np - N))[None, :]
        in_specs.append(pl.BlockSpec((1, tn), lambda i, j, k: (0, j)))
        operands.append(bias_p)
    if has_res:
        res_p = _pad2(residual.astype(jnp.bfloat16), Mp, Np)
        in_specs.append(pl.BlockSpec((tm, tn), lambda i, j, k: (i, j)))
        operands.append(res_p)
    out = pl.pallas_call(
        functools.partial(_gemm_tiled_kernel, has_bias=has_bias,
                          has_res=has_res, do_relu=do_relu),
        out_shape=jax.ShapeDtypeStruct((Mp, Np), out_dtype),
        grid_spec=pltpu.PrefetchScalarGridSpec(
            num_scalar_prefetch=0,
            grid=(Mp // tm, Np // tn, Kp // tk),
            in_specs=in_specs,
            out_specs=pl.BlockSpec((tm, tn), lambda i, j, k: (i, j)),
            scratch_shapes=[pltpu.VMEM((tm, tn), jnp.float32)]),
        compiler_params=pltpu.CompilerParams(
            dimension_semantics=("parallel", "parallel", "arbitrary"),
            vmem_limit_bytes=_VMEM_LIMIT),
    )(*operands)
    return out[:M, :N]


# ----------------------------------------------------------------------------
# Pallas kernel: batched + HW-tiled get_seed core.
#   corr  = relu(F F^T)          (HW,HW)  -- computed per stripe, never materialized
#   inter = cam @ corr           (NC,HW)
#   union = corr.colsum + cam.rowsum - inter
#   miou  = inter / union        (exact division, epilogue only)
# Zero padding of HW / C / NC contributes exactly 0 to all accumulators.
# ----------------------------------------------------------------------------
def _seed_miou_kernel(fj_ref, fk_ref, cam_ref, miou_ref,
                      inter_acc, colsum_acc, camsum_acc):
    k = pl.program_id(2)

    @pl.when(k == 0)
    def _():
        inter_acc[...] = jnp.zeros_like(inter_acc)
        colsum_acc[...] = jnp.zeros_like(colsum_acc)
        camsum_acc[...] = jnp.zeros_like(camsum_acc)

    f_j = fj_ref[0]      # (THW, C)  bf16 column block of features (output positions)
    f_k = fk_ref[0]      # (THW, C)  bf16 row    block of features (reduction positions)
    cam_k = cam_ref[0]   # (NC , THW) bf16 row   block of CAMs

    # corr[r, c] = relu(<f_k[r], f_j[c]>), contracting channels (bf16 ops, f32 accumulate).
    corr = jnp.maximum(
        lax.dot_general(f_k, f_j, (((1,), (1,)), ((), ())),
                        preferred_element_type=jnp.float32), 0.0)

    inter_acc[...] += jnp.dot(cam_k, corr.astype(jnp.bfloat16),
                              preferred_element_type=jnp.float32)
    colsum_acc[...] += jnp.sum(corr, axis=0, keepdims=True)        # symmetric -> row sums
    camsum_acc[...] += jnp.sum(cam_k.astype(jnp.float32), axis=1, keepdims=True)

    @pl.when(k == pl.num_programs(2) - 1)
    def _():
        union = colsum_acc[...] + camsum_acc[...] - inter_acc[...]
        union = jnp.maximum(union, 1e-8)        # guard 0/0 on padded rows
        miou_ref[0] = inter_acc[...] / union    # exact division (no approx reciprocal)


def seed_miou(f_norm, cam_flat):
    """f_norm:[N,HW,C] channel-normalized features, cam_flat:[N,NC,HW] -> miou:[N,NC,HW]."""
    n, hw, c = f_norm.shape
    nc = cam_flat.shape[1]
    thw = min(512, _round_up(hw, 128))          # HW stripe (512 + bf16 blocks per perf review)
    hwp = _round_up(hw, thw)
    cp = _round_up(c, 128)
    ncp = _round_up(nc, 8)

    f_p = jnp.pad(f_norm.astype(jnp.bfloat16), ((0, 0), (0, hwp - hw), (0, cp - c)))
    cam_p = jnp.pad(cam_flat.astype(jnp.bfloat16), ((0, 0), (0, ncp - nc), (0, hwp - hw)))

    miou = pl.pallas_call(
        _seed_miou_kernel,
        out_shape=jax.ShapeDtypeStruct((n, ncp, hwp), jnp.float32),
        grid_spec=pltpu.PrefetchScalarGridSpec(
            num_scalar_prefetch=0,
            grid=(n, hwp // thw, hwp // thw),
            in_specs=[pl.BlockSpec((1, thw, cp), lambda b, j, k: (b, j, 0)),
                      pl.BlockSpec((1, thw, cp), lambda b, j, k: (b, k, 0)),
                      pl.BlockSpec((1, ncp, thw), lambda b, j, k: (b, 0, k))],
            out_specs=pl.BlockSpec((1, ncp, thw), lambda b, j, k: (b, 0, j)),
            scratch_shapes=[pltpu.VMEM((ncp, thw), jnp.float32),
                            pltpu.VMEM((1, thw), jnp.float32),
                            pltpu.VMEM((ncp, 1), jnp.float32)]),
        compiler_params=pltpu.CompilerParams(
            dimension_semantics=("parallel", "parallel", "arbitrary"),
            vmem_limit_bytes=_VMEM_LIMIT),
    )(f_p, f_p, cam_p)
    return miou[:, :nc, :hw]


# ----------------------------------------------------------------------------
# Conv / pool glue (bf16 NHWC everywhere; BN folded into weights)
# ----------------------------------------------------------------------------
def _fold_bn(bn):
    scale = bn['gamma'] / jnp.sqrt(bn['var'] + 1e-5)
    bias = bn['beta'] - bn['mean'] * scale
    return scale, bias


def conv1x1(x_nhwc, w, stride=1, bn=None, do_relu=False, residual=None, out_dtype=None):
    """1x1 conv as a fused Pallas GEMM.  w: (Cout, Cin, 1, 1) PyTorch OIHW."""
    if stride > 1:
        x_nhwc = x_nhwc[:, ::stride, ::stride, :]
    n, h, wd, cin = x_nhwc.shape
    cout = w.shape[0]
    wm = w[:, :, 0, 0].T                                 # (Cin, Cout)
    bias = None
    if bn is not None:
        scale, bias = _fold_bn(bn)
        wm = wm * scale[None, :]
    res2d = None
    if residual is not None:
        res2d = residual.reshape(n * h * wd, cout)
    out = fused_matmul(x_nhwc.reshape(n * h * wd, cin), wm.astype(jnp.bfloat16),
                       bias=bias, residual=res2d, do_relu=do_relu,
                       out_dtype=out_dtype if out_dtype is not None else x_nhwc.dtype)
    return out.reshape(n, h, wd, cout)


def conv_spatial(x_nhwc, w, stride, padding, bn=None, do_relu=False):
    """3x3 / 7x7 conv via XLA conv (no im2col HBM inflation).  w: (Cout, Cin, kh, kw)."""
    # TODO(synk): replace with a halo-exchange Pallas conv; XLA conv used per perf review.
    bias = None
    if bn is not None:
        scale, bias = _fold_bn(bn)
        w = w * scale[:, None, None, None]
    out = lax.conv_general_dilated(
        x_nhwc, w.astype(jnp.bfloat16),
        window_strides=(stride, stride),
        padding=[(padding, padding), (padding, padding)],
        dimension_numbers=('NHWC', 'OIHW', 'NHWC'),
        preferred_element_type=jnp.float32)
    if bias is not None:
        out = out + bias[None, None, None, :]
    if do_relu:
        out = jnp.maximum(out, 0.0)
    return out.astype(jnp.bfloat16)


def maxpool2d(x_nhwc, k=3, stride=2, padding=1):
    return lax.reduce_window(
        x_nhwc, jnp.array(-jnp.inf, x_nhwc.dtype), lax.max,
        window_dimensions=(1, k, k, 1),
        window_strides=(1, stride, stride, 1),
        padding=((0, 0), (padding, padding), (padding, padding), (0, 0)))


def resize_bilinear_nhwc(x, out_h, out_w, align_corners=False):
    """Mirrors F.interpolate(mode='bilinear') on NHWC data."""
    n, h, w, c = x.shape
    if (h, w) == (out_h, out_w):
        return x

    def src(o, i):
        if align_corners:
            if o == 1:
                return jnp.zeros((o,), jnp.float32)
            return jnp.arange(o, dtype=jnp.float32) * ((i - 1) / (o - 1))
        return jnp.clip((jnp.arange(o, dtype=jnp.float32) + 0.5) * (i / o) - 0.5,
                        0.0, i - 1)

    ys, xs = src(out_h, h), src(out_w, w)
    y0 = jnp.floor(ys).astype(jnp.int32)
    y1 = jnp.minimum(y0 + 1, h - 1)
    wy = (ys - y0)[None, :, None, None]
    x0 = jnp.floor(xs).astype(jnp.int32)
    x1 = jnp.minimum(x0 + 1, w - 1)
    wx = (xs - x0)[None, None, :, None]
    top = x[:, y0, :, :] * (1 - wy) + x[:, y1, :, :] * wy
    return top[:, :, x0, :] * (1 - wx) + top[:, :, x1, :] * wx


def resize_nearest_nchw(x, out_h, out_w):
    n, c, h, w = x.shape
    if (h, w) == (out_h, out_w):
        return x
    yi = jnp.floor(jnp.arange(out_h) * (h / out_h)).astype(jnp.int32)
    xi = jnp.floor(jnp.arange(out_w) * (w / out_w)).astype(jnp.int32)
    return x[:, :, yi, :][:, :, :, xi]


# ----------------------------------------------------------------------------
# Parameter init (deterministic He init, identity running-stat BN)
# ----------------------------------------------------------------------------
_CFG = [(64, 3, 1), (128, 4, 2), (256, 6, 2), (512, 3, 1)]   # ResNet-50, strides=(2,2,2,1)


def _conv_init(key, cout, cin, kh, kw):
    fan_in = cin * kh * kw
    return jax.random.normal(key, (cout, cin, kh, kw), jnp.float32) * jnp.sqrt(2.0 / fan_in)


def _bn_init(c):
    return dict(gamma=jnp.ones((c,), jnp.float32), beta=jnp.zeros((c,), jnp.float32),
                mean=jnp.zeros((c,), jnp.float32), var=jnp.ones((c,), jnp.float32))


def init_params(key, num_cls):
    keys = iter(jax.random.split(key, 256))
    p = {'conv1': _conv_init(next(keys), 64, 3, 7, 7), 'bn1': _bn_init(64)}
    inplanes = 64
    for li, (planes, blocks, stride) in enumerate(_CFG, start=1):
        layer = []
        for bi in range(blocks):
            s = stride if bi == 0 else 1
            blk = {'conv1': _conv_init(next(keys), planes, inplanes, 1, 1), 'bn1': _bn_init(planes),
                   'conv2': _conv_init(next(keys), planes, planes, 3, 3), 'bn2': _bn_init(planes),
                   'conv3': _conv_init(next(keys), planes * 4, planes, 1, 1), 'bn3': _bn_init(planes * 4)}
            if s != 1 or inplanes != planes * 4:
                blk['down_conv'] = _conv_init(next(keys), planes * 4, inplanes, 1, 1)
                blk['down_bn'] = _bn_init(planes * 4)
            layer.append(blk)
            inplanes = planes * 4
        p[f'layer{li}'] = layer
    p['side1'] = _conv_init(next(keys), 128, 256, 1, 1)
    p['side2'] = _conv_init(next(keys), 128, 512, 1, 1)
    p['side3'] = _conv_init(next(keys), 256, 1024, 1, 1)
    p['side4'] = _conv_init(next(keys), 256, 2048, 1, 1)
    p['classifier'] = _conv_init(next(keys), num_cls - 1, 2048, 1, 1)
    return p


# ----------------------------------------------------------------------------
# Backbone (bf16 NHWC)
# ----------------------------------------------------------------------------
def bottleneck(x, blk, stride):
    out = conv1x1(x, blk['conv1'], 1, blk['bn1'], do_relu=True)
    out = conv_spatial(out, blk['conv2'], stride, 1, blk['bn2'], do_relu=True)
    if 'down_conv' in blk:
        sc = conv1x1(x, blk['down_conv'], stride, blk['down_bn'], do_relu=False)
    else:
        sc = x
    # residual add + final ReLU fused into the conv3 GEMM epilogue
    return conv1x1(out, blk['conv3'], 1, blk['bn3'], do_relu=True, residual=sc)


def run_layer(x, layer_params, layer_stride):
    for bi, blk in enumerate(layer_params):
        x = bottleneck(x, blk, layer_stride if bi == 0 else 1)
    return x


# ----------------------------------------------------------------------------
# Head (get_seed / get_prototype / reactivate)
# ----------------------------------------------------------------------------
def get_seed(norm_cam_nchw, label, sem_feature_nhwc):
    n, c, h, w = norm_cam_nchw.shape                    # c == num_cls
    hw = h * w
    f = sem_feature_nhwc.reshape(n, hw, -1).astype(jnp.float32)   # (N, HW, C)
    f = f / (jnp.linalg.norm(f, axis=-1, keepdims=True) + 1e-5)
    cam_flat = norm_cam_nchw.reshape(n, c, hw)
    miou = seed_miou(f, cam_flat).reshape(n, c, h, w)   # single batched Pallas call
    miou = miou.at[:, 0].multiply(0.5)
    probs = jax.nn.softmax(miou, axis=1)
    belonging = jnp.argmax(miou, axis=1)                # (N, h, w)
    seeds = jnp.transpose(jax.nn.one_hot(belonging, c, axis=-1, dtype=jnp.float32), (0, 3, 1, 2))
    seeds = seeds * label
    return seeds, probs


def get_prototype(seeds, hie_fea_nhwc):
    n, th, tw, c = hie_fea_nhwc.shape
    num_cls = seeds.shape[1]
    if seeds.shape[2:] != (th, tw):
        seeds = resize_nearest_nchw(seeds, th, tw)
    s_flat = seeds.reshape(n, num_cls, th * tw)
    f_flat = hie_fea_nhwc.reshape(n, th * tw, c)
    proto = jnp.einsum('nkp,npc->nkc', s_flat, f_flat) / float(th * tw)
    return proto[:, :, :, None, None]                   # (N, num_cls, C, 1, 1)


def reactivate(prototypes, hie_fea_nhwc):
    n, th, tw, c = hie_fea_nhwc.shape
    proto = prototypes[:, :, :, 0, 0]                   # (N, num_cls, C)
    f_flat = hie_fea_nhwc.reshape(n, th * tw, c)        # (N, HW, C)
    num = jnp.einsum('nkc,npc->nkp', proto, f_flat)     # (N, num_cls, HW)
    fn = jnp.linalg.norm(f_flat, axis=-1)[:, None, :]
    pn = jnp.linalg.norm(proto, axis=-1)[:, :, None]
    cos = num / jnp.maximum(pn * fn, 1e-8)
    is_cam = jnp.maximum(cos, 0.0).reshape(n, -1, th, tw)
    # bilinear interpolate to feature.shape[2:] is an identity here (same spatial size)
    return is_cam


# ----------------------------------------------------------------------------
# Full forward (mirrors Net.forward)
# ----------------------------------------------------------------------------
def net_forward(params, x_nchw, valid_mask):
    x = jnp.transpose(x_nchw, (0, 2, 3, 1)).astype(jnp.bfloat16)   # single boundary transpose+cast
    # stage0
    x0 = conv_spatial(x, params['conv1'], 2, 3, params['bn1'], do_relu=True)
    x0 = maxpool2d(x0, 3, 2, 1)
    x1 = run_layer(x0, params['layer1'], 1)
    x2 = run_layer(x1, params['layer2'], 2)
    x3 = run_layer(x2, params['layer3'], 2)
    x4 = run_layer(x3, params['layer4'], 1)

    # side branches (.detach() is an autograd no-op here); f32 outputs for the norm/resize head
    side1 = conv1x1(x1, params['side1'], out_dtype=jnp.float32)
    side2 = conv1x1(x2, params['side2'], out_dtype=jnp.float32)
    side3 = conv1x1(x3, params['side3'], out_dtype=jnp.float32)
    side4 = conv1x1(x4, params['side4'], out_dtype=jnp.float32)
    th, tw = side3.shape[1], side3.shape[2]

    def nrm(s):  # L2-normalize over channel (last axis in NHWC)
        return s / (jnp.linalg.norm(s, axis=-1, keepdims=True) + 1e-5)

    hie_fea = jnp.concatenate([
        resize_bilinear_nhwc(nrm(side1), th, tw, False),
        resize_bilinear_nhwc(nrm(side2), th, tw, False),
        resize_bilinear_nhwc(nrm(side3), th, tw, False),
        resize_bilinear_nhwc(nrm(side4), th, tw, False)], axis=-1)   # (N, th, tw, 768)

    cam = conv1x1(x4, params['classifier'], out_dtype=jnp.float32)   # (N, h4, w4, num_cls-1)
    score = jnp.mean(cam, axis=(1, 2))[:, :, None, None]             # (N, num_cls-1, 1, 1)

    norm_cam = jnp.maximum(cam, 0.0)
    norm_cam = norm_cam / (jnp.max(norm_cam, axis=(1, 2), keepdims=True) + 1e-5)
    cam_bkg = 1.0 - jnp.max(norm_cam, axis=-1, keepdims=True)
    norm_cam = jnp.concatenate([cam_bkg, norm_cam], axis=-1)         # (N, h4, w4, num_cls)
    norm_cam = resize_bilinear_nhwc(norm_cam, th, tw, align_corners=True)
    norm_cam = norm_cam * jnp.transpose(valid_mask, (0, 2, 3, 1))    # valid_mask -> (N,1,1,num_cls)
    norm_cam_nchw = jnp.transpose(norm_cam, (0, 3, 1, 2))            # module-boundary NCHW

    seeds, probs = get_seed(norm_cam_nchw, valid_mask, x4)
    prototypes = get_prototype(seeds, hie_fea)
    is_cam = reactivate(prototypes, hie_fea)

    return {'score': score, 'cam': norm_cam_nchw, 'seeds': seeds,
            'prototypes': prototypes, 'IS_cam': is_cam, 'probs': probs}


if __name__ == "__main__":
    num_cls = 5
    key = jax.random.PRNGKey(0)
    pkey, xkey, mkey, tkey = jax.random.split(key, 4)

    # ---- standalone Pallas GEMM checks (weight-stationary + tiled paths) ----
    k1, k2, k3, k4, k5 = jax.random.split(tkey, 5)
    a = jax.random.normal(k1, (512, 256), jnp.float32).astype(jnp.bfloat16)
    w = jax.random.normal(k2, (256, 384), jnp.float32).astype(jnp.bfloat16)
    bias = jax.random.normal(k3, (384,), jnp.float32)
    res = jax.random.normal(k4, (512, 384), jnp.float32).astype(jnp.bfloat16)
    got = fused_matmul(a, w, bias=bias, residual=res, do_relu=True, out_dtype=jnp.float32)
    ref = jnp.maximum(a.astype(jnp.float32) @ w.astype(jnp.float32)
                      + bias[None, :] + res.astype(jnp.float32), 0.0)
    rel = jnp.max(jnp.abs(got - ref)) / (jnp.max(jnp.abs(ref)) + 1e-6)
    assert float(rel) < 2e-2, float(rel)

    a2 = jax.random.normal(k5, (512, 2048), jnp.float32).astype(jnp.bfloat16)
    w2 = jax.random.normal(k1, (2048, 1536), jnp.float32).astype(jnp.bfloat16)
    got2 = fused_matmul(a2, w2, out_dtype=jnp.float32)
    ref2 = a2.astype(jnp.float32) @ w2.astype(jnp.float32)
    rel2 = jnp.max(jnp.abs(got2 - ref2)) / (jnp.max(jnp.abs(ref2)) + 1e-6)
    assert float(rel2) < 2e-2, float(rel2)

    # ---- standalone seed-mIoU kernel check ----
    f = jax.random.normal(k2, (2, 16, 256), jnp.float32)
    f = f / (jnp.linalg.norm(f, axis=-1, keepdims=True) + 1e-5)
    cam_t = jax.random.uniform(k3, (2, num_cls, 16), jnp.float32)
    got_m = seed_miou(f, cam_t)
    corr = jnp.maximum(jnp.einsum('npc,nqc->npq', f, f), 0.0)
    inter = jnp.einsum('ncq,npq->ncp', cam_t, corr)
    union = jnp.sum(corr, axis=-1)[:, None, :] + jnp.sum(cam_t, axis=-1)[:, :, None] - inter
    ref_m = inter / union
    assert float(jnp.max(jnp.abs(got_m - ref_m))) < 5e-2

    # ---- full net forward ----
    params = init_params(pkey, num_cls)
    x = jax.random.normal(xkey, (2, 3, 64, 64), jnp.float32)          # NCHW
    fg = (jax.random.uniform(mkey, (2, num_cls - 1, 1, 1)) > 0.5).astype(jnp.float32)
    valid_mask = jnp.concatenate([jnp.ones((2, 1, 1, 1), jnp.float32), fg], axis=1)

    forward = jax.jit(net_forward)
    out = forward(params, x, valid_mask)
    jax.block_until_ready(out)

    # basic shape sanity
    assert out['score'].shape == (2, num_cls - 1, 1, 1)
    assert out['cam'].shape == (2, num_cls, 4, 4)
    assert out['seeds'].shape == (2, num_cls, 4, 4)
    assert out['prototypes'].shape == (2, num_cls, 768, 1, 1)
    assert out['IS_cam'].shape == (2, num_cls, 4, 4)
    assert out['probs'].shape == (2, num_cls, 4, 4)
    print("KERNEL_OK")
</pallas_src>

<mosaic_0001>
module attributes {stable_mosaic.version = 11 : i64} {
  func.func @_gemm_ws_kernel(%arg0: i32, %arg1: memref<256x256xbf16, #tpu.memory_space<vmem>>, %arg2: memref<256x384xbf16, #tpu.memory_space<vmem>>, %arg3: memref<1x384xf32, #tpu.memory_space<vmem>>, %arg4: memref<256x384xbf16, #tpu.memory_space<vmem>>, %arg5: memref<256x384xf32, #tpu.memory_space<vmem>>) attributes {dimension_semantics = [#tpu.dimension_semantics<parallel>], iteration_bounds = array<i64: 2>, scalar_prefetch = 0 : i64, scratch_operands = 0 : i64, tpu.core_type = #tpu.core_type<tc>, window_params = [{transform_indices = @transform_0, window_bounds = array<i64: 256, 256>}, {pipeline_mode = #tpu.pipeline_mode<synchronous>, transform_indices = @transform_1, window_bounds = array<i64: 256, 384>}, {pipeline_mode = #tpu.pipeline_mode<synchronous>, transform_indices = @transform_2, window_bounds = array<i64: 1, 384>}, {transform_indices = @transform_3, window_bounds = array<i64: 256, 384>}, {transform_indices = @transform_4, window_bounds = array<i64: 256, 384>}]} {
    %c0 = arith.constant 0 : index
    %c0_0 = arith.constant 0 : index
    %0 = vector.load %arg1[%c0, %c0_0] : memref<256x256xbf16, #tpu.memory_space<vmem>>, vector<256x256xbf16>
    %c0_1 = arith.constant 0 : index
    %c0_2 = arith.constant 0 : index
    %1 = vector.load %arg2[%c0_1, %c0_2] : memref<256x384xbf16, #tpu.memory_space<vmem>>, vector<256x384xbf16>
    %cst = arith.constant dense<0.000000e+00> : vector<256x384xf32>
    %2 = tpu.matmul %0, %1, %cst {dimension_numbers = #tpu.dot_dimension_numbers<[1], [0], [0], [1], [0, 0, 1, 1], [], []>} : vector<256x256xbf16>, vector<256x384xbf16>, vector<256x384xf32> -> vector<256x384xf32>
    %c0_3 = arith.constant 0 : index
    %c0_4 = arith.constant 0 : index
    %3 = vector.load %arg3[%c0_3, %c0_4] : memref<1x384xf32, #tpu.memory_space<vmem>>, vector<1x384xf32>
    %4 = vector.broadcast %3 : vector<1x384xf32> to vector<256x384xf32>
    %5 = arith.addf %2, %4 : vector<256x384xf32>
    %c0_5 = arith.constant 0 : index
    %c0_6 = arith.constant 0 : index
    %6 = vector.load %arg4[%c0_5, %c0_6] : memref<256x384xbf16, #tpu.memory_space<vmem>>, vector<256x384xbf16>
    %7 = arith.extf %6 : vector<256x384xbf16> to vector<256x384xf32>
    %8 = arith.addf %5, %7 : vector<256x384xf32>
    %cst_7 = arith.constant 0.000000e+00 : f32
    %9 = vector.broadcast %cst_7 : f32 to vector<256x384xf32>
    %10 = arith.maximumf %8, %9 : vector<256x384xf32>
    %c0_8 = arith.constant 0 : index
    %c0_9 = arith.constant 0 : index
    %11 = vector.load %arg5[%c0_8, %c0_9] : memref<256x384xf32, #tpu.memory_space<vmem>>, vector<256x384xf32>
    tpu.vector_store %arg5[%c0_8, %c0_9], %10 {strides = array<i32>} : memref<256x384xf32, #tpu.memory_space<vmem>>, vector<256x384xf32>,
    return
  }
  func.func @transform_0(%arg0: i32) -> (i32, i32) {
    %c0_i32 = arith.constant 0 : i32
    %c0_i32_0 = arith.constant 0 : i32
    return %arg0, %c0_i32 : i32, i32
  }
  func.func @transform_1(%arg0: i32) -> (i32, i32) {
    %c0_i32 = arith.constant 0 : i32
    %c0_i32_0 = arith.constant 0 : i32
    %c0_i32_1 = arith.constant 0 : i32
    return %c0_i32, %c0_i32_0 : i32, i32
  }
  func.func @transform_2(%arg0: i32) -> (i32, i32) {
    %c0_i32 = arith.constant 0 : i32
    %c0_i32_0 = arith.constant 0 : i32
    %c0_i32_1 = arith.constant 0 : i32
    return %c0_i32, %c0_i32_0 : i32, i32
  }
  func.func @transform_3(%arg0: i32) -> (i32, i32) {
    %c0_i32 = arith.constant 0 : i32
    %c0_i32_0 = arith.constant 0 : i32
    return %arg0, %c0_i32 : i32, i32
  }
  func.func @transform_4(%arg0: i32) -> (i32, i32) {
    %c0_i32 = arith.constant 0 : i32
    %c0_i32_0 = arith.constant 0 : i32
    return %arg0, %c0_i32 : i32, i32
  }
}

</mosaic_0001>

<bundles_post_ra>
// kernel: tpu_custom_call.1
= control target key start
LH: loop header
LB: loop body
LE: loop exit
PB: predicated region body
PF: predicated region fallthrough
CT: control target
= control target key end

     0   :  { %s2835_s0 = inlined_call_operand.hbm [shape: bf16[512,256], index: 0, kind: input, shape index: {}]   ;;  %s2836_s1 = inlined_call_operand.hbm [shape: bf16[256,384], index: 1, kind: input, shape index: {}]   ;;  %s2837_s2 = inlined_call_operand.vmem [shape: f32[1,384], index: 2, kind: input, shape index: {}]   ;;  %s2838_s3 = inlined_call_operand.hbm [shape: bf16[512,384], index: 3, kind: input, shape index: {}]   ;;  %s2839_s4 = inlined_call_operand.hbm [shape: f32[512,384], index: 4, kind: output, shape index: {}]  }
   0x1   :  { %2844 = sst [smem:[#allocation13_spill]] %s2835_s0 }
   0x2   :  { %9 = vsyncpa [#allocation3], 0 }
   0x3   :  { %11 = vsyncpa [#allocation3 + $0x1], 0 }
   0x4   :  { %12 = vsyncpa [#allocation6], 0 }
   0x5   :  { %13 = vsyncpa [#allocation4], 0 }
   0x6   :  { %15 = vsyncpa [#allocation4 + $0x1], 0  ;;  %s2312_s15 = smov 0   ;;  %s2314_s16 = smov 0  }
   0x7   :  { %s2316_s17 = smov 0   ;;  %s2318_s18 = smov 0  }
   0x8 LB: > { %s2333_s19 = sadd.s32 1, %s2275_s18   ;;  %s28_s20 = sadd.s32 1, %s2271_s17  ;;  %s2275_s18 = sphi %s2318_s18, %s2863_s18   ;;  %s2271_s17 = sphi %s2316_s17, %s2862_s17   ;;  %s2267_s16 = sphi %s2314_s16, %s2861_s16   ;;  %s2263_s15 = sphi %s2312_s15, %s2860_s15  }
   0x9   : > { %s25_s21 = ssub.s32 %s2275_s18, %s2333_s19  ;;  %p35_p0 = scmp.ne.s32.totalorder %s2271_s17, %s2267_s16 }
   0xa   : > { %p26_p1 = scmp.eq.s32.totalorder %s25_s21, 0  ;;  %p36_p2 = scmp.eq.s32.totalorder %s2275_s18, 0 }
   0xb   : > { %p1967_p4 = scmp.lt.s32.totalorder %s2275_s18, 2  ;;  %s175_s23 = sand.u32 1, %s2275_s18  }
   0xc   : > { %s2344_s22 = scalar_select %p26_p1, %s2271_s17, %s28_s20  }
   0xd   : > { %p37_p5 = por %p36_p2, %p35_p0  ;;  %s177_s24 = sand.u32 1, %s2271_s17  }
   0xe   : > { %s1727_s25 = sshll.u32 %s177_s24, 8  ;;  %s1823_s26 = sshll.u32 %s2275_s18, 12 }
   0xf   : > { %s2845_s0 = sld [smem:[#allocation13_spill]]  ;;  %s179_s30 = scalar_lea.vmem [#allocation2], %s1727_s25 }
  0x10   : > { %s187_s5 = sshll.u32 %s179_s30, 4  ;;  %p2359_p6 = pnand %p1967_p4, %p37_p5  ;;  %s2363_s5 = int_to_ptr.vmem [resolvable:$true] %s187_s5 }
  0x11   : > { %s2365_s7 = scalar_lea.sflag [#allocation3], %s175_s23 }
  0x12   : > { %p2840_p8 = pneg %p2359_p6 }
  0x15   : > { %s2357_s29 = scalar_lea.hbm %s2845_s0, %s1823_s26  ;;  %s2126_s11 = scalar_lea.hbm %s2845_s0, 8192 }
  0x16   : > { %s2121_s8 = scalar_lea.hbm %s2357_s29, 4096  ;;  %p2127_p11 = scmp.lt.s32.totalorder %s2357_s29, %s2845_s0 }
  0x17   : > { %p2122_p7 = scmp.ne.s32.totalorder %s2357_s29, %s2121_s8  ;;  %p2128_p12 = scmp.lt.s32.totalorder %s2126_s11, %s2121_s8 }
  0x19   : > { %p2124_p9 = pnand %p2840_p8, %p2122_p7  ;;  %p2129_p13 = por %p2128_p12, %p2127_p11 }
  0x1b   : > { %p2125_p10 = pneg %p2124_p9 }
  0x1d   : > { %p2130_p1 = pnand %p2129_p13, %p2125_p10 }
  0x1f   : > { %2133 = shalt.err (!%p2130_p1)
}
  0x20   : > { %s2134_s14 = scalar_lea.vmem %s2363_s5, 4096  ;;  %s2277_s20 = smov [#allocation2]  }
  0x21   : > { %p2135_p2 = scmp.ne.s32.totalorder %s2363_s5, %s2134_s14  ;;  %s2139_s21 = sshll.u32 %s2277_s20, 4  ;;  %s2140_s21 = int_to_ptr.vmem [resolvable:$false] %s2139_s21 }
  0x22   : > { %s2141_s23 = scalar_lea.vmem %s2140_s21, 8192  ;;  %p2142_p7 = scmp.lt.s32.totalorder %s2363_s5, %s2140_s21 }
  0x23   : > { %p2137_p4 = pnand %p2135_p2, %p2840_p8  ;;  %p2143_p9 = scmp.lt.s32.totalorder %s2141_s23, %s2134_s14 }
  0x25   : > { %p2138_p5 = pneg %p2137_p4  ;;  %p2144_p3 = por %p2143_p9, %p2142_p7 }
  0x27   : > { %p2145_p11 = pnand %p2144_p3, %p2138_p5 }
  0x29   : > { %2148 = shalt.err (!%p2145_p11)
}
  0x2a   : > { %s2278_s25 = smov 128   ;;  %s2279_s26 = smov 8  }
  0x2b   : > { %1958 = dma.hbm_to_vmem [thread:$0]  (!%p2359_p6), %s2357_s29, 4096, %s2363_s5, %s2365_s7, %s2278_s25, %s2278_s25, %s2279_s26  }
  0x2c   : > { %s2393_s27 = sadd.s32 4294967295, %s2275_s18   ;;  %s1936_s28 = smul.u32 384, %s177_s24 }
  0x2d   : > { %s1723_s30 = sadd.s32 4294967294, %s2275_s18   ;;  %p41_p3 = scmp.ne.s32.totalorder %s2267_s16, %s2263_s15 }
  0x2e   : > { %p2841_p10 = scmp.eq.s32.totalorder %s2393_s27, 0  ;;  %p133_p12 = scmp.eq.s32.totalorder %s2393_s27, 1 }
  0x2f   : > { %p139_p13 = scmp.eq.s32.totalorder %s1723_s30, 1  ;;  %p1724_p2 = scmp.ge.s32.totalorder %s2275_s18, 1 }
  0x30   : > { %p2404_p1 = por %p2841_p10, %p41_p3  ;;  %p2412_p4 = por %p133_p12, %p35_p0 }
  0x31   : > { %p2416_p5 = por %p139_p13, %p41_p3  ;;  %p146_p7 = scmp.lt.s32.totalorder %s2275_s18, 3 }
  0x32   : > { %s2847_s8 = scalar_select %p2404_p1, 1, 0 }
  0x33   : > { %s2848_s29 = scalar_select %p2412_p4, 1, 0 }
  0x34   : > { %s2849_s5 = scalar_select %p2416_p5, 1, 0 }
  0x35   : > { %p2421_p9 = pnand %p1724_p2, %p146_p7  ;;  %s2280_s9 = smov [#allocation5]  }
  0x36   : > { %s158_s10 = sshll.u32 %s2280_s9, 4  ;;  %s1937_s11 = smul.u32 6144, %s2275_s18  ;;  %s159_s10 = int_to_ptr.vmem [resolvable:$true] %s158_s10 }
  0x37   : > { %p1951_p11 = pneg %p2421_p9  ;;  %s201_s12 = scalar_lea.vmem [#allocation7], %s1936_s28 }
  0x38   : > { %s209_s13 = sshll.u32 %s201_s12, 4  ;;  %s2437_s23 = scalar_lea.hbm %s2838_s3, %s1937_s11  ;;  %s2439_s13 = int_to_ptr.vmem [resolvable:$true] %s209_s13 }
  0x39   : > { %p2430_p0 = pnand %p1951_p11, %p2841_p10  ;;  %s2160_s25 = scalar_lea.vmem %s159_s10, 6144 }
  0x3a   : > { %p2161_p12 = scmp.ne.s32.totalorder %s159_s10, %s2160_s25  ;;  %p2168_p7 = scmp.lt.s32.totalorder %s159_s10, %s159_s10 }
  0x3b   : > { %p2151_p3 = pneg %p2430_p0  ;;  %p2169_p8 = scmp.lt.s32.totalorder %s2160_s25, %s2160_s25 }
  0x3d   : > { %p2163_p13 = pnand %p2161_p12, %p2151_p3  ;;  %p2170_p11 = por %p2169_p8, %p2168_p7 }
  0x3f   : > { %p2164_p2 = pneg %p2163_p13 }
  0x41   : > { %p2171_p10 = pnand %p2170_p11, %p2164_p2 }
  0x43   : > { %2174 = shalt.err (!%p2171_p10)
}
  0x44   : > { %s2281_s26 = smov 192   ;;  %s2282_s28 = smov 12  }
  0x45   : > { %1954 = dma.hbm_to_vmem [thread:$0]  (!%p2430_p0), %s2836_s1, 6144, %s159_s10, [#allocation6], %s2281_s26, %s2281_s26, %s2282_s28  }
  0x46   : > { %s2175_s11 = scalar_lea.hbm %s2437_s23, 6144  ;;  %p2852_p8 = pneg %p2359_p6 }
  0x47   : > { %p2176_p3 = scmp.ne.s32.totalorder %s2437_s23, %s2175_s11  ;;  %s2180_s21 = scalar_lea.hbm %s2838_s3, 12288 }
  0x48   : > { %p2181_p13 = scmp.lt.s32.totalorder %s2437_s23, %s2838_s3  ;;  %p2182_p2 = scmp.lt.s32.totalorder %s2180_s21, %s2175_s11 }
  0x49   : > { %p2178_p10 = pnand %p2176_p3, %p2852_p8 }
  0x4a   : > { %p2183_p7 = por %p2182_p2, %p2181_p13 }
  0x4b   : > { %p2179_p12 = pneg %p2178_p10 }
  0x4d   : > { %p2184_p11 = pnand %p2183_p7, %p2179_p12 }
  0x4f   : > { %2187 = shalt.err (!%p2184_p11)
}
  0x50   : > { %s2188_s10 = scalar_lea.vmem %s2439_s13, 6144  ;;  %p2853_p3 = pmov %p2852_p8 }
  0x51   : > { %p2189_p0 = scmp.ne.s32.totalorder %s2439_s13, %s2188_s10  ;;  %s2283_s14 = smov [#allocation7]  }
  0x52   : > { %s2193_s30 = sshll.u32 %s2283_s14, 4  ;;  %s2194_s30 = int_to_ptr.vmem [resolvable:$false] %s2193_s30 }
  0x53   : > { %p2191_p8 = pnand %p2189_p0, %p2853_p3  ;;  %s2195_s9 = scalar_lea.vmem %s2194_s30, 12288 }
  0x54   : > { %p2196_p5 = scmp.lt.s32.totalorder %s2439_s13, %s2194_s30  ;;  %p2197_p4 = scmp.lt.s32.totalorder %s2195_s9, %s2188_s10 }
  0x55   : > { %p2192_p10 = pneg %p2191_p8 }
  0x56   : > { %p2198_p1 = por %p2197_p4, %p2196_p5 }
  0x58   : > { %p2199_p13 = pnand %p2198_p1, %p2192_p10 }
  0x5a   : > { %2202 = shalt.err (!%p2199_p13)
}
  0x5b   : > { %1961 = dma.hbm_to_vmem [thread:$0]  (!%p2359_p6), %s2437_s23, 6144, %s2439_s13, %s2365_s7, %s2281_s26, %s2281_s26, %s2282_s28  }
  0x5c   : > { %221 = sbr.rel (%p2421_p9) target bundleno = 509 (0x1fd), region = 36  ;;  %s223_s0 = sand.u32 (!%p2421_p9), 1, %s2393_s27  }
  0x5d   : > { %s2481_s11 = sand.u32 (!%p2421_p9), 1, %s2267_s16   ;;  %s224_s20 = scalar_lea.sflag (!%p2421_p9), [#allocation3], %s223_s0 }
  0x5e   : > { %s1735_s12 = sshll.u32 (!%p2421_p9), %s2481_s11, 8  ;;  %p2854_p1 = scmp.ne.s32.totalorder (!%p2421_p9), %s2847_s8, 0 }
  0x5f   : > { %s2484_s6 = scalar_lea.vmem (!%p2421_p9), [#allocation2], %s1735_s12 }
  0x61   : > { %2246 = dma.done.wait (%p2854_p1), %s224_s20, 4096  }
  0x62   : > { %2248 = vsyncadd (%p2854_p1), %s224_s20, 4294963200  ;;  %p2855_p6 = scmp.eq.s32.totalorder %s2393_s27, 0 }
  0x64   : > { %2250 = dma.done.wait (%p2855_p6), [#allocation6], 6144   ;;  %p2856_p4 = pmov %p2855_p6 }
  0x65   : > { %s1938_s7 = smul.u32 384, %s2481_s11 }
  0x66   : > { %2252 = vsyncadd (%p2856_p4), [#allocation6], 4294961152 }
  0x67   : > { %s2495_s24 = scalar_lea.vmem [#allocation7], %s1938_s7 }
  0x68   : > { %2254 = dma.done.wait (%p2854_p1), %s224_s20, 6144  }
  0x69   : > { %2256 = vsyncadd (%p2854_p1), %s224_s20, 4294961152  ;;  %v2009_v0 = vld [vmem:[#allocation5 + $0xac] ss:$12 sps:$4 sm:$0xff]   ;;  %v2011_v1 = vld [vmem:[#allocation5 + $0xa8] ss:$12 sps:$4 sm:$0xff]   ;;  %s1939_s23 = smul.u32 768, %s2481_s11 }
  0x6a   : > { %803 = vmatprep.subr.bf16.mxu0 %v2009_v0  ;;  %v2012_v2 = vld [vmem:[#allocation5 + $0x94] ss:$12 sps:$4 sm:$0xff]   ;;  %v2014_v3 = vld [vmem:[#allocation5 + $0x90] ss:$12 sps:$4 sm:$0xff]   ;;  %v2017_v5 = vld [vmem:[#allocation5 + $0x78] ss:$12 sps:$4 sm:$0xff]  }
  0x6b   : > { %804 = vmatpush1.bf16.msra.mxu0 %v2011_v1  ;;  %v2015_v4 = vld [vmem:[#allocation5 + $0x7c] ss:$12 sps:$4 sm:$0xff]   ;;  %v2018_v6 = vld [vmem:[#allocation5 + $0x64] ss:$12 sps:$4 sm:$0xff]   ;;  %v2020_v8 = vld [vmem:[#allocation5 + $0x60] ss:$12 sps:$4 sm:$0xff]  }
  0x6c   : > { %805 = vmatprep.subr.bf16.mxu0 %v2012_v2  ;;  %v2029_v7 = vld [vmem:[#allocation5 + $0x170] ss:$12 sps:$4 sm:$0xff]   ;;  %v2021_v10 = vld [vmem:[#allocation5 + $0x4c] ss:$12 sps:$4 sm:$0xff]   ;;  %v2023_v13 = vld [vmem:[#allocation5 + $0x48] ss:$12 sps:$4 sm:$0xff]  }
  0x6d   : > { %1824 = vmatprep.subr.bf16.mxu1 %v2029_v7  ;;  %v2031_v9 = vld [vmem:[#allocation5 + $0xb0] ss:$12 sps:$4 sm:$0xff]   ;;  %v2034_v11 = vld [vmem:[#allocation5 + $0x158] ss:$12 sps:$4 sm:$0xff]   ;;  %v2024_v14 = vld [vmem:[#allocation5 + $0x34] ss:$12 sps:$4 sm:$0xff]  }
  0x6e   : > { %1825 = vmatpush3.bf16.msra.mxu1 %v2031_v9  ;;  %v2036_v12 = vld [vmem:[#allocation5 + $0x98] ss:$12 sps:$4 sm:$0xff]   ;;  %v2039_v15 = vld [vmem:[#allocation5 + $0x140] ss:$12 sps:$4 sm:$0xff]   ;;  %v2026_v17 = vld [vmem:[#allocation5 + $0x30] ss:$12 sps:$4 sm:$0xff]  }
  0x6f   : > { %806 = vmatpush1.bf16.msra.mxu0 %v2014_v3  ;;  %1826 = vmatprep.subr.bf16.mxu1 %v2034_v11  ;;  %v2041_v16 = vld [vmem:[#allocation5 + $0x80] ss:$12 sps:$4 sm:$0xff]   ;;  %v2044_v18 = vld [vmem:[#allocation5 + $0x128] ss:$12 sps:$4 sm:$0xff]   ;;  %v2030_v21 = vld [vmem:[#allocation5 + $0x18] ss:$12 sps:$4 sm:$0xff]  }
  0x70   : > { %807 = vmatprep.subr.bf16.mxu0 %v2015_v4  ;;  %v2027_v19 = vld [vmem:[#allocation5 + $0x1c] ss:$12 sps:$4 sm:$0xff]   ;;  %v2032_v23 = vld [vmem:[#allocation5 + $0x4] ss:$12 sps:$4 sm:$0xff]   ;;  %v2035_v26 = vld [vmem:[#allocation5] ss:$12 sps:$4 sm:$0xff]  }
  0x71   : > { %v2046_v20 = vld [vmem:[#allocation5 + $0x68] ss:$12 sps:$4 sm:$0xff]   ;;  %v2049_v22 = vld [vmem:[#allocation5 + $0x110] ss:$12 sps:$4 sm:$0xff]   ;;  %v2054_v25 = vld [vmem:[#allocation5 + $0xf8] ss:$12 sps:$4 sm:$0xff]  }
  0x72   : > { %1827 = vmatpush3.bf16.msra.mxu1 %v2036_v12  ;;  %v2051_v24 = vld [vmem:[#allocation5 + $0x50] ss:$12 sps:$4 sm:$0xff]   ;;  %v2037_v27 = vld [vmem:[#allocation5 + $0x16c] ss:$12 sps:$4 sm:$0xff]   ;;  %v2040_v30 = vld [vmem:[#allocation5 + $0x168] ss:$12 sps:$4 sm:$0xff]  }
  0x73   : > { %808 = vmatpush1.bf16.msra.mxu0 %v2017_v5  ;;  %1828 = vmatprep.subr.bf16.mxu1 %v2039_v15  ;;  %v2056_v28 = vld [vmem:[#allocation5 + $0x38] ss:$12 sps:$4 sm:$0xff]   ;;  %v2059_v29 = vld [vmem:[#allocation5 + $0xe0] ss:$12 sps:$4 sm:$0xff]   ;;  %v2064_v33 = vld [vmem:[#allocation5 + $0xc8] ss:$12 sps:$4 sm:$0xff]  }
  0x74   : > { %809 = vmatprep.subr.bf16.mxu0 %v2018_v6  ;;  %v2042_v31 = vld [vmem:[#allocation5 + $0x154] ss:$12 sps:$4 sm:$0xff]   ;;  %v2045_v34 = vld [vmem:[#allocation5 + $0x150] ss:$12 sps:$4 sm:$0xff]   ;;  %v2069_v35 = vld [vmem:[%s2484_s6 + $0x4] ss:$8 sps:$4 sm:$0xff]  }
  0x75   : > { %v2061_v32 = vld [vmem:[#allocation5 + $0x20] ss:$12 sps:$4 sm:$0xff]   ;;  %v2047_v36 = vld [vmem:[#allocation5 + $0x13c] ss:$12 sps:$4 sm:$0xff]   ;;  %1028 = vmatprep.mubr.bf16.mxu1 %v2069_v35  ;;  %835 = vmatprep.mubr.bf16.mxu0 %v2069_v35  ;;  %v2050_v38 = vld [vmem:[#allocation5 + $0x138] ss:$12 sps:$4 sm:$0xff]  }
  0x76   : > { %1829 = vmatpush3.bf16.msra.mxu1 %v2041_v16  ;;  %v2066_v37 = vld [vmem:[#allocation5 + $0x8] ss:$12 sps:$4 sm:$0xff]   ;;  %v2052_v39 = vld [vmem:[#allocation5 + $0x124] ss:$12 sps:$4 sm:$0xff]   ;;  %v2055_v42 = vld [vmem:[#allocation5 + $0x120] ss:$12 sps:$4 sm:$0xff]   ;;  %v372_v16 = vlaneseq }
  0x77   : > { %810 = vmatpush1.bf16.msra.mxu0 %v2020_v8  ;;  %1830 = vmatprep.subr.bf16.mxu1 %v2044_v18  ;;  %v2067_v40 = vld [vmem:[%s2484_s6] ss:$8 sps:$4 sm:$0xff]   ;;  %v2076_v41 = vld [vmem:[%s2484_s6 + $0x14] ss:$8 sps:$4 sm:$0xff]   ;;  %v2057_v43 = vld [vmem:[#allocation5 + $0x10c] ss:$12 sps:$4 sm:$0xff]  }
  0x78   : > { %811 = vmatprep.subr.bf16.mxu0 %v2021_v10  ;;  %v2060_v44 = vld [vmem:[#allocation5 + $0x108] ss:$12 sps:$4 sm:$0xff]   ;;  %v2078_v46 = vld [vmem:[%s2484_s6 + $0x10] ss:$8 sps:$4 sm:$0xff]   ;;  %v2079_v47 = vld [vmem:[%s2484_s6 + $0x24] ss:$8 sps:$4 sm:$0xff]  }
  0x79   : > { %v2062_v45 = vld [vmem:[#allocation5 + $0xf4] ss:$12 sps:$4 sm:$0xff]   ;;  %v2065_v48 = vld [vmem:[#allocation5 + $0xf0] ss:$12 sps:$4 sm:$0xff]   ;;  %v2072_v50 = vld [vmem:[#allocation5 + $0xd8] ss:$12 sps:$4 sm:$0xff]  }
  0x7a   : > { %1831 = vmatpush3.bf16.msra.mxu1 %v2046_v20  ;;  %v2070_v49 = vld [vmem:[#allocation5 + $0xdc] ss:$12 sps:$4 sm:$0xff]   ;;  %v2073_v51 = vld [vmem:[#allocation5 + $0xc4] ss:$12 sps:$4 sm:$0xff]   ;;  %v2075_v54 = vld [vmem:[#allocation5 + $0xc0] ss:$12 sps:$4 sm:$0xff]  }
  0x7b   : > { %812 = vmatpush1.bf16.msra.mxu0 %v2023_v13  ;;  %1832 = vmatprep.subr.bf16.mxu1 %v2049_v22  ;;  %v2081_v52 = vld [vmem:[%s2484_s6 + $0x20] ss:$8 sps:$4 sm:$0xff]   ;;  %v2082_v53 = vld [vmem:[%s2484_s6 + $0x34] ss:$8 sps:$4 sm:$0xff]   ;;  %v2084_v55 = vld [vmem:[%s2484_s6 + $0x30] ss:$8 sps:$4 sm:$0xff]  }
  0x7c   : > { %813 = vmatprep.subr.bf16.mxu0 %v2024_v14  ;;  %v2085_v56 = vld [vmem:[%s2484_s6 + $0x44] ss:$8 sps:$4 sm:$0xff]   ;;  %v2087_v57 = vld [vmem:[%s2484_s6 + $0x40] ss:$8 sps:$4 sm:$0xff]   ;;  %v2088_v58 = vld [vmem:[%s2484_s6 + $0x54] ss:$8 sps:$4 sm:$0xff]  }
  0x7d   : > { %v2090_v59 = vld [vmem:[%s2484_s6 + $0x50] ss:$8 sps:$4 sm:$0xff]   ;;  %v2091_v60 = vld [vmem:[%s2484_s6 + $0x64] ss:$8 sps:$4 sm:$0xff]   ;;  %v2093_v61 = vld [vmem:[%s2484_s6 + $0x60] ss:$8 sps:$4 sm:$0xff]  }
  0x7e   : > { %1833 = vmatpush3.bf16.msra.mxu1 %v2051_v24  ;;  %v2094_v62 = vld [vmem:[%s2484_s6 + $0x74] ss:$8 sps:$4 sm:$0xff]   ;;  %v2096_v63 = vld [vmem:[%s2484_s6 + $0x70] ss:$8 sps:$4 sm:$0xff]   ;;  %v2097_v0 = vld [vmem:[%s2484_s6 + $0x84] ss:$8 sps:$4 sm:$0xff]  }
  0x7f   : > { %814 = vmatpush1.bf16.msra.mxu0 %v2026_v17  ;;  %1834 = vmatprep.subr.bf16.mxu1 %v2054_v25  ;;  %v2099_v1 = vld [vmem:[%s2484_s6 + $0x80] ss:$8 sps:$4 sm:$0xff]   ;;  %v2100_v2 = vld [vmem:[%s2484_s6 + $0x94] ss:$8 sps:$4 sm:$0xff]   ;;  %v2102_v3 = vld [vmem:[%s2484_s6 + $0x90] ss:$8 sps:$4 sm:$0xff]  }
  0x80   : > { %815 = vmatprep.subr.bf16.mxu0 %v2027_v19  ;;  %v2103_v4 = vld [vmem:[%s2484_s6 + $0xa4] ss:$8 sps:$4 sm:$0xff]   ;;  %v2105_v5 = vld [vmem:[%s2484_s6 + $0xa0] ss:$8 sps:$4 sm:$0xff]   ;;  %v2106_v6 = vld [vmem:[%s2484_s6 + $0xb4] ss:$8 sps:$4 sm:$0xff]  }
  0x81   : > { %v2108_v7 = vld [vmem:[%s2484_s6 + $0xb0] ss:$8 sps:$4 sm:$0xff]   ;;  %v2109_v8 = vld [vmem:[%s2484_s6 + $0xc4] ss:$8 sps:$4 sm:$0xff]   ;;  %v2111_v9 = vld [vmem:[%s2484_s6 + $0xc0] ss:$8 sps:$4 sm:$0xff]  }
  0x82   : > { %1835 = vmatpush3.bf16.msra.mxu1 %v2056_v28  ;;  %v2112_v10 = vld [vmem:[%s2484_s6 + $0xd4] ss:$8 sps:$4 sm:$0xff]   ;;  %v2114_v11 = vld [vmem:[%s2484_s6 + $0xd0] ss:$8 sps:$4 sm:$0xff]   ;;  %v2115_v12 = vld [vmem:[%s2484_s6 + $0xe4] ss:$8 sps:$4 sm:$0xff]  }
  0x83   : > { %816 = vmatpush1.bf16.msra.mxu0 %v2030_v21  ;;  %1836 = vmatprep.subr.bf16.mxu1 %v2059_v29  ;;  %v2117_v13 = vld [vmem:[%s2484_s6 + $0xe0] ss:$8 sps:$4 sm:$0xff]   ;;  %v2118_v14 = vld [vmem:[%s2484_s6 + $0xf4] ss:$8 sps:$4 sm:$0xff]   ;;  %v2120_v15 = vld [vmem:[%s2484_s6 + $0xf0] ss:$8 sps:$4 sm:$0xff]  }
  0x84   : > { %817 = vmatprep.subr.bf16.mxu0 %v2032_v23  ;;  %v373_v17 = vshrl.u32 %v372_v16, 7  ;;  %v370_v19 = vld [vmem:[%s2837_s2] sm:$0x7]  ;;  %v1158_v21 = vld [vmem:[%s2495_s24 + $0x8] ss:$12 sps:$4 sm:$0xff]   ;;  %s2543_s26 = scalar_lea.vmem [#allocation8], %s1939_s23 }
  0x85   : > { %v1223_v25 = vunpack.c.l.bf16 %v1158_v21  ;;  %v1170_v16 = vld [vmem:[%s2495_s24 + $0x50] ss:$12 sps:$4 sm:$0xff]   ;;  %s1940_s28 = smul.u32 12288, %s2393_s27  ;;  %s1620_s21 = sshll.u32 %s2543_s26, 4  ;;  %s2790_s21 = int_to_ptr.vmem [resolvable:$true] %s1620_s21 }
  0x86   : > { %1837 = vmatpush3.bf16.msra.mxu1 %v2061_v32  ;;  %v382_v18 = vsub.s32 2, %v373_v17  ;;  %s1606_s27 = scalar_lea.sflag [#allocation4], %s2481_s11  ;;  %s2203_s30 = scalar_lea.vmem %s2790_s21, 12288 }
  0x87   : > { %818 = vmatpush1.bf16.msra.mxu0 %v2035_v26  ;;  %1838 = vmatprep.subr.bf16.mxu1 %v2064_v33  ;;  %v1162_v33 = vld [vmem:[%s2495_s24 + $0x20] ss:$12 sps:$4 sm:$0xff]   ;;  %s2788_s14 = scalar_lea.hbm %s2839_s4, %s1940_s28  ;;  %p2204_p5 = scmp.ne.s32.totalorder %s2790_s21, %s2203_s30 }
  0x88   : > { %819 = vmatprep.subr.bf16.mxu0 %v2037_v27  ;;  %v2537_v22 = vrot.slane %v370_v19, %v382_v18  ;;  %p2857_p9 = scmp.ne.s32.totalorder %s2848_s29, 0  ;;  %s2284_s9 = smov [#allocation8]  }
  0x89   : > { %s2207_s0 = sshll.u32 %s2284_s9, 4  ;;  %s2208_s0 = int_to_ptr.vmem [resolvable:$false] %s2207_s0 }
  0x8a   : > { %1839 = vmatpush3.bf16.msra.mxu1 %v2066_v37  ;;  %p2205_p12 = pnand %p2204_p5, %p2857_p9  ;;  %s2209_s12 = scalar_lea.vmem %s2208_s0, 24576 }
  0x8b   : > { %820 = vmatpush2.bf16.msra.mxu0 %v2040_v30  ;;  %p2210_p7 = scmp.lt.s32.totalorder %s2790_s21, %s2208_s0  ;;  %p2211_p11 = scmp.lt.s32.totalorder %s2209_s12, %s2203_s30 }
  0x8c   : > { %821 = vmatprep.subr.bf16.mxu0 %v2042_v31  ;;  %v1226_v31 = vunpack.c.h.bf16 %v1158_v21  ;;  %p2206_p2 = pneg %p2205_p12 }
  0x8d   : > { %1029 = vmatmul.mubr.bf16.vlgmr.msra.gmra.mxu1 %v2067_v40  ;;  %p2212_p0 = por %p2211_p11, %p2210_p7 }
  0x8e   : > { %1036 = vmatprep.mubr.bf16.mxu1 %v2076_v41 }
  0x8f   : > { %822 = vmatpush2.bf16.msra.mxu0 %v2045_v34  ;;  %p2213_p3 = pnand %p2212_p0, %p2206_p2 }
  0x90   : > { %823 = vmatprep.subr.bf16.mxu0 %v2047_v36 }
  0x93   : > { %824 = vmatpush2.bf16.msra.mxu0 %v2050_v38 }
  0x94   : > { %825 = vmatprep.subr.bf16.mxu0 %v2052_v39  ;;  %v1229_v39 = vunpack.c.l.bf16 %v1162_v33 }
  0x95   : > { %1037 = vmatmul.mubr.bf16.gmra.mxu1 %v2078_v46 }
  0x96   : > { %1044 = vmatprep.mubr.bf16.mxu1 %v2079_v47 }
  0x97   : > { %826 = vmatpush2.bf16.msra.mxu0 %v2055_v42 }
  0x98   : > { %827 = vmatprep.subr.bf16.mxu0 %v2057_v43 }
  0x9b   : > { %828 = vmatpush2.bf16.msra.mxu0 %v2060_v44  ;;  %v374_v44 = vsub.s32 0, %v373_v17 }
  0x9c   : > { %829 = vmatprep.subr.bf16.mxu0 %v2062_v45 }
  0x9d   : > { %1045 = vmatmul.mubr.bf16.gmra.mxu1 %v2081_v52 }
  0x9e   : > { %1052 = vmatprep.mubr.bf16.mxu1 %v2082_v53 }
  0x9f   : > { %830 = vmatpush2.bf16.msra.mxu0 %v2065_v48 }
  0xa0   : > { %831 = vmatprep.subr.bf16.mxu0 %v2070_v49  ;;  %v1166_v49 = vld [vmem:[%s2495_s24 + $0x38] ss:$12 sps:$4 sm:$0xff]  }
  0xa3   : > { %832 = vmatpush2.bf16.msra.mxu0 %v2072_v50  ;;  %v378_v50 = vsub.s32 1, %v373_v17 }
  0xa4   : > { %833 = vmatprep.subr.bf16.mxu0 %v2073_v51 }
  0xa5   : > { %1053 = vmatmul.mubr.bf16.gmra.mxu1 %v2084_v55 }
  0xa6   : > { %1060 = vmatprep.mubr.bf16.mxu1 %v2085_v56 }
  0xa7   : > { %834 = vmatpush2.bf16.msra.mxu0 %v2075_v54 }
  0xaa   : > { %836 = vmatmul.mubr.bf16.vlgmr.msra.gmra.mxu0 %v2067_v40 }
  0xab   : > { %845 = vmatprep.mubr.bf16.mxu0 %v2076_v41 }
  0xad   : > { %1061 = vmatmul.mubr.bf16.gmra.mxu1 %v2087_v57 }
  0xae   : > { %1068 = vmatprep.mubr.bf16.mxu1 %v2088_v58 }
  0xb2   : > { %846 = vmatmul.mubr.bf16.gmra.mxu0 %v2078_v46 }
  0xb3   : > { %855 = vmatprep.mubr.bf16.mxu0 %v2079_v47  ;;  %v1232_v47 = vunpack.c.h.bf16 %v1162_v33  ;;  %v1163_v33 = vld [vmem:[%s2495_s24 + $0x24] sm:$0xff] }
  0xb5   : > { %1069 = vmatmul.mubr.bf16.gmra.mxu1 %v2090_v59 }
  0xb6   : > { %1076 = vmatprep.mubr.bf16.mxu1 %v2091_v60 }
  0xba   : > { %856 = vmatmul.mubr.bf16.gmra.mxu0 %v2081_v52 }
  0xbb   : > { %865 = vmatprep.mubr.bf16.mxu0 %v2082_v53  ;;  %v1157_v53 = vld [vmem:[%s2495_s24] sm:$0xff] }
  0xbd   : > { %1077 = vmatmul.mubr.bf16.gmra.mxu1 %v2093_v61 }
  0xbe   : > { %1084 = vmatprep.mubr.bf16.mxu1 %v2094_v62 }
  0xc2   : > { %866 = vmatmul.mubr.bf16.gmra.mxu0 %v2084_v55  ;;  %v2551_v55 = vrot.slane %v370_v19, %v374_v44 }
  0xc3   : > { %875 = vmatprep.mubr.bf16.mxu0 %v2085_v56 }
  0xc5   : > { %1085 = vmatmul.mubr.bf16.gmra.mxu1 %v2096_v63 }
  0xc6   : > { %1092 = vmatprep.mubr.bf16.mxu1 %v2097_v0 }
  0xca   : > { %876 = vmatmul.mubr.bf16.gmra.mxu0 %v2087_v57 }
  0xcb   : > { %885 = vmatprep.mubr.bf16.mxu0 %v2088_v58  ;;  %v1235_v58 = vunpack.c.l.bf16 %v1166_v49 }
  0xcd   : > { %1093 = vmatmul.mubr.bf16.gmra.mxu1 %v2099_v1 }
  0xce   : > { %1100 = vmatprep.mubr.bf16.mxu1 %v2100_v2 }
  0xd2   : > { %886 = vmatmul.mubr.bf16.gmra.mxu0 %v2090_v59 }
  0xd3   : > { %895 = vmatprep.mubr.bf16.mxu0 %v2091_v60  ;;  %v1221_v60 = vunpack.c.l.bf16 %v1157_v53 }
  0xd5   : > { %1101 = vmatmul.mubr.bf16.gmra.mxu1 %v2102_v3 }
  0xd6   : > { %1108 = vmatprep.mubr.bf16.mxu1 %v2103_v4 }
  0xda   : > { %896 = vmatmul.mubr.bf16.gmra.mxu0 %v2093_v61  ;;  %v2554_v61 = vrot.slane %v370_v19, %v378_v50 }
  0xdb   : > { %905 = vmatprep.mubr.bf16.mxu0 %v2094_v62  ;;  %v1159_v62 = vld [vmem:[%s2495_s24 + $0xc] sm:$0xff] }
  0xdc   : > { %v1225_v18 = vunpack.c.h.bf16 %v1159_v62 }
  0xdd   : > { %1109 = vmatmul.mubr.bf16.gmra.mxu1 %v2105_v5 }
  0xde   : > { %1116 = vmatprep.mubr.bf16.mxu1 %v2106_v6 }
  0xe2   : > { %906 = vmatmul.mubr.bf16.gmra.mxu0 %v2096_v63 }
  0xe3   : > { %915 = vmatprep.mubr.bf16.mxu0 %v2097_v0 }
  0xe5   : > { %1117 = vmatmul.mubr.bf16.gmra.mxu1 %v2108_v7 }
  0xe6   : > { %1124 = vmatprep.mubr.bf16.mxu1 %v2109_v8 }
  0xea   : > { %916 = vmatmul.mubr.bf16.gmra.mxu0 %v2099_v1 }
  0xeb   : > { %925 = vmatprep.mubr.bf16.mxu0 %v2100_v2  ;;  %v1222_v2 = vunpack.c.h.bf16 %v1157_v53  ;;  %v1174_v53 = vld [vmem:[%s2495_s24 + $0x68] ss:$12 sps:$4 sm:$0xff]  }
  0xed   : > { %1125 = vmatmul.mubr.bf16.gmra.mxu1 %v2111_v9 }
  0xee   : > { %1132 = vmatprep.mubr.bf16.mxu1 %v2112_v10 }
  0xf2   : > { %926 = vmatmul.mubr.bf16.gmra.mxu0 %v2102_v3 }
  0xf3   : > { %935 = vmatprep.mubr.bf16.mxu0 %v2103_v4 }
  0xf5   : > { %1133 = vmatmul.mubr.bf16.gmra.mxu1 %v2114_v11 }
  0xf6   : > { %1140 = vmatprep.mubr.bf16.mxu1 %v2115_v12 }
  0xfa   : > { %936 = vmatmul.mubr.bf16.gmra.mxu0 %v2105_v5 }
  0xfb   : > { %945 = vmatprep.mubr.bf16.mxu0 %v2106_v6 }
  0xfd   : > { %1141 = vmatmul.mubr.bf16.gmra.mxu1 %v2117_v13 }
  0xfe   : > { %1148 = vmatprep.mubr.bf16.mxu1 %v2118_v14 }
 0x102   : > { %946 = vmatmul.mubr.bf16.gmra.mxu0 %v2108_v7  ;;  %v1238_v7 = vunpack.c.h.bf16 %v1166_v49 }
 0x103   : > { %955 = vmatprep.mubr.bf16.mxu0 %v2109_v8 }
 0x105   : > { %1149 = vmatmul.mubr.bf16.gmra.mxu1 %v2120_v15 }
 0x10a   : > { %956 = vmatmul.mubr.bf16.gmra.mxu0 %v2111_v9  ;;  %v1224_v9 = vunpack.c.l.bf16 %v1159_v62 }
 0x10b   : > { %965 = vmatprep.mubr.bf16.mxu0 %v2112_v10 }
 0x112   : > { %966 = vmatmul.mubr.bf16.gmra.mxu0 %v2114_v11 }
 0x113   : > { %975 = vmatprep.mubr.bf16.mxu0 %v2115_v12 }
 0x11a   : > { %976 = vmatmul.mubr.bf16.gmra.mxu0 %v2117_v13  ;;  %v1161_v13 = vld [vmem:[%s2495_s24 + $0x18] sm:$0xff] }
 0x11b   : > { %985 = vmatprep.mubr.bf16.mxu0 %v2118_v14 }
 0x122   : > { %986 = vmatmul.mubr.bf16.gmra.mxu0 %v2120_v15 }
 0x14d   : > { %v1840_v20 = vpop.f32.mrf.mxu1 }
 0x14f   : > { %v1841_v23 = vpop.f32.mrf.mxu1 }
 0x150   : > { %v1842_v24 = vadd.f32 %v1841_v23, %v1840_v20 }
 0x151   : > { %v1843_v26 = vpop.f32.mrf.mxu1 }
 0x152   : > { %v1031_v27 = vadd.f32 %v1842_v24, %v2537_v22 }
 0x153   : > { %v1844_v28 = vpop.f32.mrf.mxu1 }
 0x154   : > { %v1319_v29 = vadd.f32 %v1223_v25, %v1031_v27  ;;  %v1845_v30 = vadd.f32 %v1844_v28, %v1843_v26  ;;  %v1227_v26 = vunpack.c.l.bf16 %v1161_v13  ;;  %v1241_v28 = vunpack.c.l.bf16 %v1170_v16 }
 0x155   : > { %v1846_v32 = vpop.f32.mrf.mxu1 }
 0x156   : > { %v1415_v34 = vmax.f32 %v1319_v29, 0.0  ;;  %v1034_v35 = vadd.f32 %v1845_v30, %v2537_v22 }
 0x157   : > { %v1847_v36 = vpop.f32.mrf.mxu1 }
 0x158   : > { %1511 = vst [vmem:[%s2543_s26 + $0x10] sm:$0xff] %v1415_v34  ;;  %v1322_v37 = vadd.f32 %v1226_v31, %v1034_v35  ;;  %v1848_v38 = vadd.f32 %v1847_v36, %v1846_v32  ;;  %v1228_v36 = vunpack.c.h.bf16 %v1161_v13 }
 0x159   : > { %v1849_v40 = vpop.f32.mrf.mxu1 }
 0x15a   : > { %v1418_v41 = vmax.f32 %v1322_v37, 0.0  ;;  %v1039_v42 = vadd.f32 %v1848_v38, %v2537_v22 }
 0x15b   : > { %v1850_v43 = vpop.f32.mrf.mxu1 }
 0x15c   : > { %1514 = vst [vmem:[%s2543_s26 + $0x28] sm:$0xff] %v1418_v41  ;;  %v1325_v45 = vadd.f32 %v1229_v39, %v1039_v42  ;;  %v1851_v46 = vadd.f32 %v1850_v43, %v1849_v40  ;;  %v1244_v39 = vunpack.c.h.bf16 %v1170_v16 }
 0x15d   : > { %v1852_v48 = vpop.f32.mrf.mxu1 }
 0x15e   : > { %v1421_v51 = vmax.f32 %v1325_v45, 0.0  ;;  %v1042_v52 = vadd.f32 %v1851_v46, %v2537_v22  ;;  %v1230_v45 = vunpack.c.l.bf16 %v1163_v33 }
 0x15f   : > { %v1853_v54 = vpop.f32.mrf.mxu1 }
 0x160   : > { %1517 = vst [vmem:[%s2543_s26 + $0x40] sm:$0xff] %v1421_v51  ;;  %v1328_v56 = vadd.f32 %v1232_v47, %v1042_v52  ;;  %v1854_v57 = vadd.f32 %v1853_v54, %v1852_v48  ;;  %v1165_v51 = vld [vmem:[%s2495_s24 + $0x30] sm:$0xff] }
 0x161   : > { %v1855_v59 = vpop.f32.mrf.mxu1 }
 0x162   : > { %v1424_v63 = vmax.f32 %v1328_v56, 0.0  ;;  %v1047_v0 = vadd.f32 %v1854_v57, %v2537_v22  ;;  %v1231_v56 = vunpack.c.h.bf16 %v1163_v33 }
 0x163   : > { %v1856_v3 = vpop.f32.mrf.mxu1 }
 0x164   : > { %1520 = vst [vmem:[%s2543_s26 + $0x58] sm:$0xff] %v1424_v63  ;;  %v1331_v5 = vadd.f32 %v1235_v58, %v1047_v0  ;;  %v1857_v6 = vadd.f32 %v1856_v3, %v1855_v59  ;;  %v1247_v3 = vunpack.c.l.bf16 %v1174_v53 }
 0x165   : > { %v1858_v10 = vpop.f32.mrf.mxu1 }
 0x166   : > { %v1427_v14 = vmax.f32 %v1331_v5, 0.0  ;;  %v1050_v15 = vadd.f32 %v1857_v6, %v2537_v22 }
 0x167   : > { %v1859_v19 = vpop.f32.mrf.mxu1 }
 0x168   : > { %1523 = vst [vmem:[%s2543_s26 + $0x70] sm:$0xff] %v1427_v14  ;;  %v1334_v24 = vadd.f32 %v1238_v7, %v1050_v15  ;;  %v1860_v27 = vadd.f32 %v1859_v19, %v1858_v10  ;;  %v1250_v14 = vunpack.c.h.bf16 %v1174_v53 }
 0x169   : > { %v1861_v29 = vpop.f32.mrf.mxu1 }
 0x16a   : > { %v837_v1 = vpop.f32.mrf.mxu0  ;;  %v1430_v34 = vmax.f32 %v1334_v24, 0.0  ;;  %v1055_v37 = vadd.f32 %v1860_v27, %v2537_v22  ;;  %v1169_v27 = vld [vmem:[%s2495_s24 + $0x48] sm:$0xff] }
 0x16b   : > { %v838_v4 = vadd.f32 %v837_v1, %v2551_v55  ;;  %v1862_v38 = vpop.f32.mrf.mxu1  ;;  %v1233_v1 = vunpack.c.l.bf16 %v1165_v51 }
 0x16c   : > { %v839_v8 = vpop.f32.mrf.mxu0  ;;  %1526 = vst [vmem:[%s2543_s26 + $0x88] sm:$0xff] %v1430_v34  ;;  %v1863_v43 = vadd.f32 %v1862_v38, %v1861_v29  ;;  %v1337_v46 = vadd.f32 %v1241_v28, %v1055_v37  ;;  %v1178_v29 = vld [vmem:[%s2495_s24 + $0x80] ss:$12 sps:$4 sm:$0xff]  }
 0x16d   : > { %v1317_v11 = vadd.f32 %v1221_v60, %v838_v4  ;;  %v840_v12 = vadd.f32 %v839_v8, %v2554_v61  ;;  %v1864_v47 = vpop.f32.mrf.mxu1  ;;  %v1167_v8 = vld [vmem:[%s2495_s24 + $0x3c] sm:$0xff] }
 0x16e   : > { %v841_v17 = vpop.f32.mrf.mxu0  ;;  %v1058_v52 = vadd.f32 %v1863_v43, %v2537_v22  ;;  %v1433_v57 = vmax.f32 %v1337_v46, 0.0  ;;  %v1171_v46 = vld [vmem:[%s2495_s24 + $0x54] sm:$0xff] }
 0x16f   : > { %v1413_v20 = vmax.f32 %v1317_v11, 0.0  ;;  %v1318_v21 = vadd.f32 %v1222_v2, %v840_v12  ;;  %v842_v23 = vadd.f32 %v841_v17, %v2551_v55  ;;  %v1865_v58 = vpop.f32.mrf.mxu1  ;;  %v1234_v11 = vunpack.c.h.bf16 %v1165_v51 }
 0x170   : > { %v843_v25 = vpop.f32.mrf.mxu0  ;;  %v1340_v63 = vadd.f32 %v1244_v39, %v1058_v52  ;;  %1529 = vst [vmem:[%s2543_s26 + $0xa0] sm:$0xff] %v1433_v57  ;;  %v1866_v2 = vadd.f32 %v1865_v58, %v1864_v47  ;;  %v1239_v39 = vunpack.c.l.bf16 %v1169_v27  ;;  %v1256_v52 = vunpack.c.h.bf16 %v1178_v29 }
 0x171   : > { %1509 = vst [vmem:[%s2543_s26] sm:$0xff] %v1413_v20  ;;  %v1414_v30 = vmax.f32 %v1318_v21, 0.0  ;;  %v1320_v31 = vadd.f32 %v1224_v9, %v842_v23  ;;  %v844_v32 = vadd.f32 %v843_v25, %v2554_v61  ;;  %v1867_v4 = vpop.f32.mrf.mxu1  ;;  %v1236_v20 = vunpack.c.l.bf16 %v1167_v8 }
 0x172   : > { %v847_v35 = vpop.f32.mrf.mxu0  ;;  %v1436_v9 = vmax.f32 %v1340_v63, 0.0  ;;  %v1063_v12 = vadd.f32 %v1866_v2, %v2537_v22  ;;  %v1173_v2 = vld [vmem:[%s2495_s24 + $0x60] sm:$0xff] }
 0x173   : > { %1510 = vst [vmem:[%s2543_s26 + $0x8] sm:$0xff] %v1414_v30  ;;  %v1416_v40 = vmax.f32 %v1320_v31, 0.0  ;;  %v1321_v41 = vadd.f32 %v1225_v18, %v844_v32  ;;  %v848_v42 = vadd.f32 %v847_v35, %v2551_v55  ;;  %v1868_v13 = vpop.f32.mrf.mxu1  ;;  %v1237_v31 = vunpack.c.h.bf16 %v1167_v8 }
 0x174   : > { %v849_v44 = vpop.f32.mrf.mxu0  ;;  %1532 = vst [vmem:[%s2543_s26 + $0xb8] sm:$0xff] %v1436_v9  ;;  %v1869_v18 = vadd.f32 %v1868_v13, %v1867_v4  ;;  %v1343_v21 = vadd.f32 %v1247_v3, %v1063_v12  ;;  %v1182_v4 = vld [vmem:[%s2495_s24 + $0x98] ss:$12 sps:$4 sm:$0xff]  }
 0x175   : > { %1512 = vst [vmem:[%s2543_s26 + $0x18] sm:$0xff] %v1416_v40  ;;  %v1417_v48 = vmax.f32 %v1321_v41, 0.0  ;;  %v1323_v49 = vadd.f32 %v1227_v26, %v848_v42  ;;  %v850_v50 = vadd.f32 %v849_v44, %v2554_v61  ;;  %v1870_v23 = vpop.f32.mrf.mxu1  ;;  %v1253_v41 = vunpack.c.l.bf16 %v1178_v29 }
 0x176   : > { %v851_v54 = vpop.f32.mrf.mxu0  ;;  %v1066_v28 = vadd.f32 %v1869_v18, %v2537_v22  ;;  %v1439_v32 = vmax.f32 %v1343_v21, 0.0  ;;  %v1175_v21 = vld [vmem:[%s2495_s24 + $0x6c] sm:$0xff] }
 0x177   : > { %1513 = vst [vmem:[%s2543_s26 + $0x20] sm:$0xff] %v1417_v48  ;;  %v1419_v59 = vmax.f32 %v1323_v49, 0.0  ;;  %v1324_v60 = vadd.f32 %v1228_v36, %v850_v50  ;;  %v852_v62 = vadd.f32 %v851_v54, %v2551_v55  ;;  %v1871_v33 = vpop.f32.mrf.mxu1  ;;  %v1240_v49 = vunpack.c.h.bf16 %v1169_v27 }
 0x178   : > { %v853_v0 = vpop.f32.mrf.mxu0  ;;  %v1346_v37 = vadd.f32 %v1250_v14, %v1066_v28  ;;  %1535 = vst [vmem:[%s2543_s26 + $0xd0] sm:$0xff] %v1439_v32  ;;  %v1872_v40 = vadd.f32 %v1871_v33, %v1870_v23  ;;  %v1245_v14 = vunpack.c.l.bf16 %v1173_v2  ;;  %v1262_v28 = vunpack.c.h.bf16 %v1182_v4 }
 0x179   : > { %1515 = vst [vmem:[%s2543_s26 + $0x30] sm:$0xff] %v1419_v59  ;;  %v1420_v5 = vmax.f32 %v1324_v60, 0.0  ;;  %v1326_v6 = vadd.f32 %v1230_v45, %v852_v62  ;;  %v854_v7 = vadd.f32 %v853_v0, %v2554_v61  ;;  %v1873_v42 = vpop.f32.mrf.mxu1  ;;  %v1242_v59 = vunpack.c.l.bf16 %v1171_v46 }
 0x17a   : > { %v857_v10 = vpop.f32.mrf.mxu0  ;;  %v1442_v47 = vmax.f32 %v1346_v37, 0.0  ;;  %v1071_v50 = vadd.f32 %v1872_v40, %v2537_v22  ;;  %v1177_v40 = vld [vmem:[%s2495_s24 + $0x78] sm:$0xff] }
 0x17b   : > { %1516 = vst [vmem:[%s2543_s26 + $0x38] sm:$0xff] %v1420_v5  ;;  %v1422_v15 = vmax.f32 %v1326_v6, 0.0  ;;  %v1327_v16 = vadd.f32 %v1231_v56, %v854_v7  ;;  %v858_v17 = vadd.f32 %v857_v10, %v2551_v55  ;;  %v1874_v51 = vpop.f32.mrf.mxu1  ;;  %v1243_v6 = vunpack.c.h.bf16 %v1171_v46 }
 0x17c   : > { %v859_v19 = vpop.f32.mrf.mxu0  ;;  %1538 = vst [vmem:[%s2543_s26 + $0xe8] sm:$0xff] %v1442_v47  ;;  %v1875_v57 = vadd.f32 %v1874_v51, %v1873_v42  ;;  %v1349_v60 = vadd.f32 %v1253_v41, %v1071_v50  ;;  %v1186_v42 = vld [vmem:[%s2495_s24 + $0xb0] ss:$12 sps:$4 sm:$0xff]  }
 0x17d   : > { %1518 = vst [vmem:[%s2543_s26 + $0x48] sm:$0xff] %v1422_v15  ;;  %v1423_v24 = vmax.f32 %v1327_v16, 0.0  ;;  %v1329_v25 = vadd.f32 %v1233_v1, %v858_v17  ;;  %v860_v26 = vadd.f32 %v859_v19, %v2554_v61  ;;  %v1876_v62 = vpop.f32.mrf.mxu1  ;;  %v1259_v16 = vunpack.c.l.bf16 %v1182_v4 }
 0x17e   : > { %v861_v30 = vpop.f32.mrf.mxu0  ;;  %v1074_v3 = vadd.f32 %v1875_v57, %v2537_v22  ;;  %v1445_v7 = vmax.f32 %v1349_v60, 0.0  ;;  %v1179_v60 = vld [vmem:[%s2495_s24 + $0x84] sm:$0xff] }
 0x17f   : > { %1519 = vst [vmem:[%s2543_s26 + $0x50] sm:$0xff] %v1423_v24  ;;  %v1425_v34 = vmax.f32 %v1329_v25, 0.0  ;;  %v1330_v35 = vadd.f32 %v1234_v11, %v860_v26  ;;  %v862_v36 = vadd.f32 %v861_v30, %v2551_v55  ;;  %v1877_v8 = vpop.f32.mrf.mxu1  ;;  %v1246_v25 = vunpack.c.h.bf16 %v1173_v2 }
 0x180   : > { %v863_v38 = vpop.f32.mrf.mxu0  ;;  %v1352_v12 = vadd.f32 %v1256_v52, %v1074_v3  ;;  %1541 = vst [vmem:[%s2543_s26 + $0x100] sm:$0xff] %v1445_v7  ;;  %v1878_v15 = vadd.f32 %v1877_v8, %v1876_v62  ;;  %v1251_v52 = vunpack.c.l.bf16 %v1177_v40  ;;  %v1268_v3 = vunpack.c.h.bf16 %v1186_v42 }
 0x181   : > { %1521 = vst [vmem:[%s2543_s26 + $0x60] sm:$0xff] %v1425_v34  ;;  %v1426_v43 = vmax.f32 %v1330_v35, 0.0  ;;  %v1332_v44 = vadd.f32 %v1236_v20, %v862_v36  ;;  %v864_v45 = vadd.f32 %v863_v38, %v2554_v61  ;;  %v1879_v17 = vpop.f32.mrf.mxu1  ;;  %v1248_v34 = vunpack.c.l.bf16 %v1175_v21 }
 0x182   : > { %v867_v48 = vpop.f32.mrf.mxu0  ;;  %v1448_v23 = vmax.f32 %v1352_v12, 0.0  ;;  %v1079_v26 = vadd.f32 %v1878_v15, %v2537_v22  ;;  %v1181_v15 = vld [vmem:[%s2495_s24 + $0x90] sm:$0xff] }
 0x183   : > { %1522 = vst [vmem:[%s2543_s26 + $0x68] sm:$0xff] %v1426_v43  ;;  %v1428_v53 = vmax.f32 %v1332_v44, 0.0  ;;  %v1333_v54 = vadd.f32 %v1237_v31, %v864_v45  ;;  %v868_v56 = vadd.f32 %v867_v48, %v2551_v55  ;;  %v1880_v27 = vpop.f32.mrf.mxu1  ;;  %v1249_v44 = vunpack.c.h.bf16 %v1175_v21 }
 0x184   : > { %v869_v58 = vpop.f32.mrf.mxu0  ;;  %1544 = vst [vmem:[%s2543_s26 + $0x118] sm:$0xff] %v1448_v23  ;;  %v1881_v32 = vadd.f32 %v1880_v27, %v1879_v17  ;;  %v1355_v35 = vadd.f32 %v1259_v16, %v1079_v26  ;;  %v1190_v17 = vld [vmem:[%s2495_s24 + $0xc8] ss:$12 sps:$4 sm:$0xff]  }
 0x185   : > { %1524 = vst [vmem:[%s2543_s26 + $0x78] sm:$0xff] %v1428_v53  ;;  %v1429_v63 = vmax.f32 %v1333_v54, 0.0  ;;  %v1335_v0 = vadd.f32 %v1239_v39, %v868_v56  ;;  %v870_v1 = vadd.f32 %v869_v58, %v2554_v61  ;;  %v1882_v36 = vpop.f32.mrf.mxu1  ;;  %v1265_v54 = vunpack.c.l.bf16 %v1186_v42 }
 0x186   : > { %v871_v5 = vpop.f32.mrf.mxu0  ;;  %v1082_v41 = vadd.f32 %v1881_v32, %v2537_v22  ;;  %v1451_v45 = vmax.f32 %v1355_v35, 0.0  ;;  %v1183_v35 = vld [vmem:[%s2495_s24 + $0x9c] sm:$0xff] }
 0x187   : > { %1525 = vst [vmem:[%s2543_s26 + $0x80] sm:$0xff] %v1429_v63  ;;  %v1431_v9 = vmax.f32 %v1335_v0, 0.0  ;;  %v1336_v10 = vadd.f32 %v1240_v49, %v870_v1  ;;  %v872_v11 = vadd.f32 %v871_v5, %v2551_v55  ;;  %v1883_v46 = vpop.f32.mrf.mxu1  ;;  %v1252_v0 = vunpack.c.h.bf16 %v1177_v40 }
 0x188   : > { %v873_v13 = vpop.f32.mrf.mxu0  ;;  %v1358_v50 = vadd.f32 %v1262_v28, %v1082_v41  ;;  %1547 = vst [vmem:[%s2543_s26 + $0x130] sm:$0xff] %v1451_v45  ;;  %v1884_v53 = vadd.f32 %v1883_v46, %v1882_v36  ;;  %v1257_v28 = vunpack.c.l.bf16 %v1181_v15  ;;  %v1274_v41 = vunpack.c.h.bf16 %v1190_v17 }
 0x189   : > { %1527 = vst [vmem:[%s2543_s26 + $0x90] sm:$0xff] %v1431_v9  ;;  %v1432_v18 = vmax.f32 %v1336_v10, 0.0  ;;  %v1338_v19 = vadd.f32 %v1242_v59, %v872_v11  ;;  %v874_v20 = vadd.f32 %v873_v13, %v2554_v61  ;;  %v1885_v56 = vpop.f32.mrf.mxu1  ;;  %v1254_v9 = vunpack.c.l.bf16 %v1179_v60 }
 0x18a   : > { %v877_v24 = vpop.f32.mrf.mxu0  ;;  %v1454_v62 = vmax.f32 %v1358_v50, 0.0  ;;  %v1087_v1 = vadd.f32 %v1884_v53, %v2537_v22  ;;  %v1185_v53 = vld [vmem:[%s2495_s24 + $0xa8] sm:$0xff] }
 0x18b   : > { %1528 = vst [vmem:[%s2543_s26 + $0x98] sm:$0xff] %v1432_v18  ;;  %v1434_v29 = vmax.f32 %v1338_v19, 0.0  ;;  %v1339_v30 = vadd.f32 %v1243_v6, %v874_v20  ;;  %v878_v31 = vadd.f32 %v877_v24, %v2551_v55  ;;  %v1886_v2 = vpop.f32.mrf.mxu1  ;;  %v1255_v19 = vunpack.c.h.bf16 %v1179_v60 }
 0x18c   : > { %v879_v33 = vpop.f32.mrf.mxu0  ;;  %1550 = vst [vmem:[%s2543_s26 + $0x148] sm:$0xff] %v1454_v62  ;;  %v1887_v7 = vadd.f32 %v1886_v2, %v1885_v56  ;;  %v1361_v10 = vadd.f32 %v1265_v54, %v1087_v1  ;;  %v1194_v56 = vld [vmem:[%s2495_s24 + $0xe0] ss:$12 sps:$4 sm:$0xff]  }
 0x18d   : > { %1530 = vst [vmem:[%s2543_s26 + $0xa8] sm:$0xff] %v1434_v29  ;;  %v1435_v37 = vmax.f32 %v1339_v30, 0.0  ;;  %v1341_v38 = vadd.f32 %v1245_v14, %v878_v31  ;;  %v880_v39 = vadd.f32 %v879_v33, %v2554_v61  ;;  %v1888_v11 = vpop.f32.mrf.mxu1  ;;  %v1271_v30 = vunpack.c.l.bf16 %v1190_v17 }
 0x18e   : > { %v881_v43 = vpop.f32.mrf.mxu0  ;;  %v1090_v16 = vadd.f32 %v1887_v7, %v2537_v22  ;;  %v1457_v20 = vmax.f32 %v1361_v10, 0.0  ;;  %v1187_v10 = vld [vmem:[%s2495_s24 + $0xb4] sm:$0xff] }
 0x18f   : > { %1531 = vst [vmem:[%s2543_s26 + $0xb0] sm:$0xff] %v1435_v37  ;;  %v1437_v47 = vmax.f32 %v1341_v38, 0.0  ;;  %v1342_v48 = vadd.f32 %v1246_v25, %v880_v39  ;;  %v882_v49 = vadd.f32 %v881_v43, %v2551_v55  ;;  %v1889_v21 = vpop.f32.mrf.mxu1  ;;  %v1258_v38 = vunpack.c.h.bf16 %v1181_v15 }
 0x190   : > { %v883_v51 = vpop.f32.mrf.mxu0  ;;  %v1364_v26 = vadd.f32 %v1268_v3, %v1090_v16  ;;  %1553 = vst [vmem:[%s2543_s26 + $0x160] sm:$0xff] %v1457_v20  ;;  %v1890_v29 = vadd.f32 %v1889_v21, %v1888_v11  ;;  %v1263_v3 = vunpack.c.l.bf16 %v1185_v53  ;;  %v1280_v16 = vunpack.c.h.bf16 %v1194_v56 }
 0x191   : > { %1533 = vst [vmem:[%s2543_s26 + $0xc0] sm:$0xff] %v1437_v47  ;;  %v1438_v57 = vmax.f32 %v1342_v48, 0.0  ;;  %v1344_v58 = vadd.f32 %v1248_v34, %v882_v49  ;;  %v884_v59 = vadd.f32 %v883_v51, %v2554_v61  ;;  %v1891_v31 = vpop.f32.mrf.mxu1  ;;  %v1260_v47 = vunpack.c.l.bf16 %v1183_v35 }
 0x192   : > { %v887_v63 = vpop.f32.mrf.mxu0  ;;  %v1460_v36 = vmax.f32 %v1364_v26, 0.0  ;;  %v1095_v39 = vadd.f32 %v1890_v29, %v2537_v22  ;;  %v1189_v29 = vld [vmem:[%s2495_s24 + $0xc0] sm:$0xff] }
 0x193   : > { %1534 = vst [vmem:[%s2543_s26 + $0xc8] sm:$0xff] %v1438_v57  ;;  %v1440_v4 = vmax.f32 %v1344_v58, 0.0  ;;  %v1345_v5 = vadd.f32 %v1249_v44, %v884_v59  ;;  %v888_v6 = vadd.f32 %v887_v63, %v2551_v55  ;;  %v1892_v40 = vpop.f32.mrf.mxu1  ;;  %v1261_v58 = vunpack.c.h.bf16 %v1183_v35 }
 0x194   : > { %v889_v8 = vpop.f32.mrf.mxu0  ;;  %1556 = vst [vmem:[%s2543_s26 + $0x178] sm:$0xff] %v1460_v36  ;;  %v1893_v45 = vadd.f32 %v1892_v40, %v1891_v31  ;;  %v1367_v48 = vadd.f32 %v1271_v30, %v1095_v39  ;;  %v1198_v31 = vld [vmem:[%s2495_s24 + $0xf8] ss:$12 sps:$4 sm:$0xff]  }
 0x195   : > { %1536 = vst [vmem:[%s2543_s26 + $0xd8] sm:$0xff] %v1440_v4  ;;  %v1441_v12 = vmax.f32 %v1345_v5, 0.0  ;;  %v1347_v13 = vadd.f32 %v1251_v52, %v888_v6  ;;  %v890_v14 = vadd.f32 %v889_v8, %v2554_v61  ;;  %v1894_v49 = vpop.f32.mrf.mxu1  ;;  %v1277_v5 = vunpack.c.l.bf16 %v1194_v56 }
 0x196   : > { %v891_v18 = vpop.f32.mrf.mxu0  ;;  %v1098_v54 = vadd.f32 %v1893_v45, %v2537_v22  ;;  %v1463_v59 = vmax.f32 %v1367_v48, 0.0  ;;  %v1191_v48 = vld [vmem:[%s2495_s24 + $0xcc] sm:$0xff] }
 0x197   : > { %1537 = vst [vmem:[%s2543_s26 + $0xe0] sm:$0xff] %v1441_v12  ;;  %v1443_v23 = vmax.f32 %v1347_v13, 0.0  ;;  %v1348_v24 = vadd.f32 %v1252_v0, %v890_v14  ;;  %v892_v25 = vadd.f32 %v891_v18, %v2551_v55  ;;  %v1895_v60 = vpop.f32.mrf.mxu1  ;;  %v1264_v13 = vunpack.c.h.bf16 %v1185_v53 }
 0x198   : > { %v893_v27 = vpop.f32.mrf.mxu0  ;;  %v1370_v1 = vadd.f32 %v1274_v41, %v1098_v54  ;;  %1559 = vst [vmem:[%s2543_s26 + $0x190] sm:$0xff] %v1463_v59  ;;  %v1896_v4 = vadd.f32 %v1895_v60, %v1894_v49  ;;  %v1269_v41 = vunpack.c.l.bf16 %v1189_v29  ;;  %v1286_v54 = vunpack.c.h.bf16 %v1198_v31 }
 0x199   : > { %1539 = vst [vmem:[%s2543_s26 + $0xf0] sm:$0xff] %v1443_v23  ;;  %v1444_v32 = vmax.f32 %v1348_v24, 0.0  ;;  %v1350_v33 = vadd.f32 %v1254_v9, %v892_v25  ;;  %v894_v34 = vadd.f32 %v893_v27, %v2554_v61  ;;  %v1897_v6 = vpop.f32.mrf.mxu1  ;;  %v1266_v23 = vunpack.c.l.bf16 %v1187_v10 }
 0x19a   : > { %v897_v37 = vpop.f32.mrf.mxu0  ;;  %v1466_v11 = vmax.f32 %v1370_v1, 0.0  ;;  %v1103_v14 = vadd.f32 %v1896_v4, %v2537_v22  ;;  %v1193_v4 = vld [vmem:[%s2495_s24 + $0xd8] sm:$0xff] }
 0x19b   : > { %1540 = vst [vmem:[%s2543_s26 + $0xf8] sm:$0xff] %v1444_v32  ;;  %v1446_v42 = vmax.f32 %v1350_v33, 0.0  ;;  %v1351_v43 = vadd.f32 %v1255_v19, %v894_v34  ;;  %v898_v44 = vadd.f32 %v897_v37, %v2551_v55  ;;  %v1898_v15 = vpop.f32.mrf.mxu1  ;;  %v1267_v33 = vunpack.c.h.bf16 %v1187_v10 }
 0x19c   : > { %v899_v46 = vpop.f32.mrf.mxu0  ;;  %1562 = vst [vmem:[%s2543_s26 + $0x1a8] sm:$0xff] %v1466_v11  ;;  %v1899_v20 = vadd.f32 %v1898_v15, %v1897_v6  ;;  %v1373_v24 = vadd.f32 %v1277_v5, %v1103_v14  ;;  %v1202_v6 = vld [vmem:[%s2495_s24 + $0x110] ss:$12 sps:$4 sm:$0xff]  }
 0x19d   : > { %1542 = vst [vmem:[%s2543_s26 + $0x108] sm:$0xff] %v1446_v42  ;;  %v1447_v50 = vmax.f32 %v1351_v43, 0.0  ;;  %v1353_v51 = vadd.f32 %v1257_v28, %v898_v44  ;;  %v900_v52 = vadd.f32 %v899_v46, %v2554_v61  ;;  %v1900_v25 = vpop.f32.mrf.mxu1  ;;  %v1283_v43 = vunpack.c.l.bf16 %v1198_v31 }
 0x19e   : > { %v901_v57 = vpop.f32.mrf.mxu0  ;;  %v1106_v30 = vadd.f32 %v1899_v20, %v2537_v22  ;;  %v1469_v34 = vmax.f32 %v1373_v24, 0.0  ;;  %v1195_v24 = vld [vmem:[%s2495_s24 + $0xe4] sm:$0xff] }
 0x19f   : > { %1543 = vst [vmem:[%s2543_s26 + $0x110] sm:$0xff] %v1447_v50  ;;  %v1449_v62 = vmax.f32 %v1353_v51, 0.0  ;;  %v1354_v63 = vadd.f32 %v1258_v38, %v900_v52  ;;  %v902_v0 = vadd.f32 %v901_v57, %v2551_v55  ;;  %v1901_v35 = vpop.f32.mrf.mxu1  ;;  %v1270_v51 = vunpack.c.h.bf16 %v1189_v29 }
 0x1a0   : > { %v903_v2 = vpop.f32.mrf.mxu0  ;;  %v1376_v39 = vadd.f32 %v1280_v16, %v1106_v30  ;;  %1565 = vst [vmem:[%s2543_s26 + $0x1c0] sm:$0xff] %v1469_v34  ;;  %v1902_v42 = vadd.f32 %v1901_v35, %v1900_v25  ;;  %v1275_v16 = vunpack.c.l.bf16 %v1193_v4  ;;  %v1292_v30 = vunpack.c.h.bf16 %v1202_v6 }
 0x1a1   : > { %1545 = vst [vmem:[%s2543_s26 + $0x120] sm:$0xff] %v1449_v62  ;;  %v1450_v7 = vmax.f32 %v1354_v63, 0.0  ;;  %v1356_v8 = vadd.f32 %v1260_v47, %v902_v0  ;;  %v904_v9 = vadd.f32 %v903_v2, %v2554_v61  ;;  %v1903_v44 = vpop.f32.mrf.mxu1  ;;  %v1272_v62 = vunpack.c.l.bf16 %v1191_v48 }
 0x1a2   : > { %v907_v12 = vpop.f32.mrf.mxu0  ;;  %v1472_v49 = vmax.f32 %v1376_v39, 0.0  ;;  %v1111_v52 = vadd.f32 %v1902_v42, %v2537_v22  ;;  %v1197_v42 = vld [vmem:[%s2495_s24 + $0xf0] sm:$0xff] }
 0x1a3   : > { %1546 = vst [vmem:[%s2543_s26 + $0x128] sm:$0xff] %v1450_v7  ;;  %v1452_v17 = vmax.f32 %v1356_v8, 0.0  ;;  %v1357_v18 = vadd.f32 %v1261_v58, %v904_v9  ;;  %v908_v19 = vadd.f32 %v907_v12, %v2551_v55  ;;  %v1904_v53 = vpop.f32.mrf.mxu1  ;;  %v1273_v8 = vunpack.c.h.bf16 %v1191_v48 }
 0x1a4   : > { %v909_v21 = vpop.f32.mrf.mxu0  ;;  %1568 = vst [vmem:[%s2543_s26 + $0x1d8] sm:$0xff] %v1472_v49  ;;  %v1905_v59 = vadd.f32 %v1904_v53, %v1903_v44  ;;  %v1379_v63 = vadd.f32 %v1283_v43, %v1111_v52  ;;  %v1206_v44 = vld [vmem:[%s2495_s24 + $0x128] ss:$12 sps:$4 sm:$0xff]  }
 0x1a5   : > { %1548 = vst [vmem:[%s2543_s26 + $0x138] sm:$0xff] %v1452_v17  ;;  %v1453_v26 = vmax.f32 %v1357_v18, 0.0  ;;  %v1359_v27 = vadd.f32 %v1263_v3, %v908_v19  ;;  %v910_v28 = vadd.f32 %v909_v21, %v2554_v61  ;;  %v1906_v0 = vpop.f32.mrf.mxu1  ;;  %v1289_v18 = vunpack.c.l.bf16 %v1202_v6 }
 0x1a6   : > { %v911_v32 = vpop.f32.mrf.mxu0  ;;  %v1114_v5 = vadd.f32 %v1905_v59, %v2537_v22  ;;  %v1475_v9 = vmax.f32 %v1379_v63, 0.0  ;;  %v1199_v63 = vld [vmem:[%s2495_s24 + $0xfc] sm:$0xff] }
 0x1a7   : > { %1549 = vst [vmem:[%s2543_s26 + $0x140] sm:$0xff] %v1453_v26  ;;  %v1455_v36 = vmax.f32 %v1359_v27, 0.0  ;;  %v1360_v37 = vadd.f32 %v1264_v13, %v910_v28  ;;  %v912_v38 = vadd.f32 %v911_v32, %v2551_v55  ;;  %v1907_v10 = vpop.f32.mrf.mxu1  ;;  %v1276_v27 = vunpack.c.h.bf16 %v1193_v4 }
 0x1a8   : > { %v913_v40 = vpop.f32.mrf.mxu0  ;;  %v1382_v14 = vadd.f32 %v1286_v54, %v1114_v5  ;;  %1571 = vst [vmem:[%s2543_s26 + $0x1f0] sm:$0xff] %v1475_v9  ;;  %v1908_v17 = vadd.f32 %v1907_v10, %v1906_v0  ;;  %v1281_v54 = vunpack.c.l.bf16 %v1197_v42  ;;  %v1298_v5 = vunpack.c.h.bf16 %v1206_v44 }
 0x1a9   : > { %1551 = vst [vmem:[%s2543_s26 + $0x150] sm:$0xff] %v1455_v36  ;;  %v1456_v45 = vmax.f32 %v1360_v37, 0.0  ;;  %v1362_v46 = vadd.f32 %v1266_v23, %v912_v38  ;;  %v914_v47 = vadd.f32 %v913_v40, %v2554_v61  ;;  %v1909_v19 = vpop.f32.mrf.mxu1  ;;  %v1278_v36 = vunpack.c.l.bf16 %v1195_v24 }
 0x1aa   : > { %v917_v50 = vpop.f32.mrf.mxu0  ;;  %v1478_v25 = vmax.f32 %v1382_v14, 0.0  ;;  %v1119_v28 = vadd.f32 %v1908_v17, %v2537_v22  ;;  %v1201_v17 = vld [vmem:[%s2495_s24 + $0x108] sm:$0xff] }
 0x1ab   : > { %1552 = vst [vmem:[%s2543_s26 + $0x158] sm:$0xff] %v1456_v45  ;;  %v1458_v56 = vmax.f32 %v1362_v46, 0.0  ;;  %v1363_v57 = vadd.f32 %v1267_v33, %v914_v47  ;;  %v918_v58 = vadd.f32 %v917_v50, %v2551_v55  ;;  %v1910_v29 = vpop.f32.mrf.mxu1  ;;  %v1279_v46 = vunpack.c.h.bf16 %v1195_v24 }
 0x1ac   : > { %v919_v60 = vpop.f32.mrf.mxu0  ;;  %1574 = vst [vmem:[%s2543_s26 + $0x208] sm:$0xff] %v1478_v25  ;;  %v1911_v34 = vadd.f32 %v1910_v29, %v1909_v19  ;;  %v1385_v37 = vadd.f32 %v1289_v18, %v1119_v28  ;;  %v1210_v19 = vld [vmem:[%s2495_s24 + $0x140] ss:$12 sps:$4 sm:$0xff]  }
 0x1ad   : > { %1554 = vst [vmem:[%s2543_s26 + $0x168] sm:$0xff] %v1458_v56  ;;  %v1459_v1 = vmax.f32 %v1363_v57, 0.0  ;;  %v1365_v2 = vadd.f32 %v1269_v41, %v918_v58  ;;  %v920_v3 = vadd.f32 %v919_v60, %v2554_v61  ;;  %v1912_v38 = vpop.f32.mrf.mxu1  ;;  %v1295_v57 = vunpack.c.l.bf16 %v1206_v44 }
 0x1ae   : > { %v921_v7 = vpop.f32.mrf.mxu0  ;;  %v1122_v43 = vadd.f32 %v1911_v34, %v2537_v22  ;;  %v1481_v47 = vmax.f32 %v1385_v37, 0.0  ;;  %v1203_v37 = vld [vmem:[%s2495_s24 + $0x114] sm:$0xff] }
 0x1af   : > { %1555 = vst [vmem:[%s2543_s26 + $0x170] sm:$0xff] %v1459_v1  ;;  %v1461_v11 = vmax.f32 %v1365_v2, 0.0  ;;  %v1366_v12 = vadd.f32 %v1270_v51, %v920_v3  ;;  %v922_v13 = vadd.f32 %v921_v7, %v2551_v55  ;;  %v1913_v48 = vpop.f32.mrf.mxu1  ;;  %v1282_v2 = vunpack.c.h.bf16 %v1197_v42 }
 0x1b0   : > { %v923_v15 = vpop.f32.mrf.mxu0  ;;  %v1388_v52 = vadd.f32 %v1292_v30, %v1122_v43  ;;  %1577 = vst [vmem:[%s2543_s26 + $0x220] sm:$0xff] %v1481_v47  ;;  %v1914_v56 = vadd.f32 %v1913_v48, %v1912_v38  ;;  %v1287_v30 = vunpack.c.l.bf16 %v1201_v17  ;;  %v1304_v43 = vunpack.c.h.bf16 %v1210_v19 }
 0x1b1   : > { %1557 = vst [vmem:[%s2543_s26 + $0x180] sm:$0xff] %v1461_v11  ;;  %v1462_v20 = vmax.f32 %v1366_v12, 0.0  ;;  %v1368_v21 = vadd.f32 %v1272_v62, %v922_v13  ;;  %v924_v23 = vadd.f32 %v923_v15, %v2554_v61  ;;  %v1915_v58 = vpop.f32.mrf.mxu1  ;;  %v1284_v11 = vunpack.c.l.bf16 %v1199_v63 }
 0x1b2   : > { %v927_v26 = vpop.f32.mrf.mxu0  ;;  %v1484_v0 = vmax.f32 %v1388_v52, 0.0  ;;  %v1127_v3 = vadd.f32 %v1914_v56, %v2537_v22  ;;  %v1205_v56 = vld [vmem:[%s2495_s24 + $0x120] sm:$0xff] }
 0x1b3   : > { %1558 = vst [vmem:[%s2543_s26 + $0x188] sm:$0xff] %v1462_v20  ;;  %v1464_v31 = vmax.f32 %v1368_v21, 0.0  ;;  %v1369_v32 = vadd.f32 %v1273_v8, %v924_v23  ;;  %v928_v33 = vadd.f32 %v927_v26, %v2551_v55  ;;  %v1916_v4 = vpop.f32.mrf.mxu1  ;;  %v1285_v21 = vunpack.c.h.bf16 %v1199_v63 }
 0x1b4   : > { %v929_v35 = vpop.f32.mrf.mxu0  ;;  %1580 = vst [vmem:[%s2543_s26 + $0x238] sm:$0xff] %v1484_v0  ;;  %v1917_v9 = vadd.f32 %v1916_v4, %v1915_v58  ;;  %v1391_v12 = vadd.f32 %v1295_v57, %v1127_v3  ;;  %v1214_v58 = vld [vmem:[%s2495_s24 + $0x158] ss:$12 sps:$4 sm:$0xff]  }
 0x1b5   : > { %1560 = vst [vmem:[%s2543_s26 + $0x198] sm:$0xff] %v1464_v31  ;;  %v1465_v39 = vmax.f32 %v1369_v32, 0.0  ;;  %v1371_v40 = vadd.f32 %v1275_v16, %v928_v33  ;;  %v930_v41 = vadd.f32 %v929_v35, %v2554_v61  ;;  %v1918_v13 = vpop.f32.mrf.mxu1  ;;  %v1301_v32 = vunpack.c.l.bf16 %v1210_v19 }
 0x1b6   : > { %v931_v45 = vpop.f32.mrf.mxu0  ;;  %v1130_v18 = vadd.f32 %v1917_v9, %v2537_v22  ;;  %v1487_v23 = vmax.f32 %v1391_v12, 0.0  ;;  %v1207_v12 = vld [vmem:[%s2495_s24 + $0x12c] sm:$0xff] }
 0x1b7   : > { %1561 = vst [vmem:[%s2543_s26 + $0x1a0] sm:$0xff] %v1465_v39  ;;  %v1467_v49 = vmax.f32 %v1371_v40, 0.0  ;;  %v1372_v50 = vadd.f32 %v1276_v27, %v930_v41  ;;  %v932_v51 = vadd.f32 %v931_v45, %v2551_v55  ;;  %v1919_v24 = vpop.f32.mrf.mxu1  ;;  %v1288_v40 = vunpack.c.h.bf16 %v1201_v17 }
 0x1b8   : > { %v933_v53 = vpop.f32.mrf.mxu0  ;;  %v1394_v28 = vadd.f32 %v1298_v5, %v1130_v18  ;;  %1583 = vst [vmem:[%s2543_s26 + $0x250] sm:$0xff] %v1487_v23  ;;  %v1920_v31 = vadd.f32 %v1919_v24, %v1918_v13  ;;  %v1293_v5 = vunpack.c.l.bf16 %v1205_v56  ;;  %v1310_v18 = vunpack.c.h.bf16 %v1214_v58 }
 0x1b9   : > { %1563 = vst [vmem:[%s2543_s26 + $0x1b0] sm:$0xff] %v1467_v49  ;;  %v1468_v59 = vmax.f32 %v1372_v50, 0.0  ;;  %v1374_v60 = vadd.f32 %v1278_v36, %v932_v51  ;;  %v934_v62 = vadd.f32 %v933_v53, %v2554_v61  ;;  %v1921_v33 = vpop.f32.mrf.mxu1  ;;  %v1290_v49 = vunpack.c.l.bf16 %v1203_v37 }
 0x1ba   : > { %v937_v1 = vpop.f32.mrf.mxu0  ;;  %v1490_v38 = vmax.f32 %v1394_v28, 0.0  ;;  %v1135_v41 = vadd.f32 %v1920_v31, %v2537_v22  ;;  %v1209_v31 = vld [vmem:[%s2495_s24 + $0x138] sm:$0xff] }
 0x1bb   : > { %1564 = vst [vmem:[%s2543_s26 + $0x1b8] sm:$0xff] %v1468_v59  ;;  %v1470_v6 = vmax.f32 %v1374_v60, 0.0  ;;  %v1375_v7 = vadd.f32 %v1279_v46, %v934_v62  ;;  %v938_v8 = vadd.f32 %v937_v1, %v2551_v55  ;;  %v1922_v42 = vpop.f32.mrf.mxu1  ;;  %v1291_v60 = vunpack.c.h.bf16 %v1203_v37 }
 0x1bc   : > { %v939_v10 = vpop.f32.mrf.mxu0  ;;  %1586 = vst [vmem:[%s2543_s26 + $0x268] sm:$0xff] %v1490_v38  ;;  %v1923_v47 = vadd.f32 %v1922_v42, %v1921_v33  ;;  %v1397_v50 = vadd.f32 %v1301_v32, %v1135_v41  ;;  %v1218_v33 = vld [vmem:[%s2495_s24 + $0x170] ss:$12 sps:$4 sm:$0xff]  }
 0x1bd   : > { %1566 = vst [vmem:[%s2543_s26 + $0x1c8] sm:$0xff] %v1470_v6  ;;  %v1471_v14 = vmax.f32 %v1375_v7, 0.0  ;;  %v1377_v15 = vadd.f32 %v1281_v54, %v938_v8  ;;  %v940_v16 = vadd.f32 %v939_v10, %v2554_v61  ;;  %v1924_v51 = vpop.f32.mrf.mxu1  ;;  %v1307_v7 = vunpack.c.l.bf16 %v1214_v58 }
 0x1be   : > { %v941_v20 = vpop.f32.mrf.mxu0  ;;  %v1138_v57 = vadd.f32 %v1923_v47, %v2537_v22  ;;  %v1493_v62 = vmax.f32 %v1397_v50, 0.0  ;;  %v1211_v50 = vld [vmem:[%s2495_s24 + $0x144] sm:$0xff] }
 0x1bf   : > { %1567 = vst [vmem:[%s2543_s26 + $0x1d0] sm:$0xff] %v1471_v14  ;;  %v1473_v25 = vmax.f32 %v1377_v15, 0.0  ;;  %v1378_v26 = vadd.f32 %v1282_v2, %v940_v16  ;;  %v942_v27 = vadd.f32 %v941_v20, %v2551_v55  ;;  %v1925_v63 = vpop.f32.mrf.mxu1  ;;  %v1294_v15 = vunpack.c.h.bf16 %v1205_v56 }
 0x1c0   : > { %v943_v29 = vpop.f32.mrf.mxu0  ;;  %v1400_v3 = vadd.f32 %v1304_v43, %v1138_v57  ;;  %1589 = vst [vmem:[%s2543_s26 + $0x280] sm:$0xff] %v1493_v62  ;;  %v1926_v6 = vadd.f32 %v1925_v63, %v1924_v51  ;;  %v1299_v43 = vunpack.c.l.bf16 %v1209_v31  ;;  %v1316_v57 = vunpack.c.h.bf16 %v1218_v33 }
 0x1c1   : > { %1569 = vst [vmem:[%s2543_s26 + $0x1e0] sm:$0xff] %v1473_v25  ;;  %v1474_v34 = vmax.f32 %v1378_v26, 0.0  ;;  %v1380_v35 = vadd.f32 %v1284_v11, %v942_v27  ;;  %v944_v36 = vadd.f32 %v943_v29, %v2554_v61  ;;  %v1927_v8 = vpop.f32.mrf.mxu1  ;;  %v1296_v25 = vunpack.c.l.bf16 %v1207_v12 }
 0x1c2   : > { %v947_v39 = vpop.f32.mrf.mxu0  ;;  %v1496_v13 = vmax.f32 %v1400_v3, 0.0  ;;  %v1143_v16 = vadd.f32 %v1926_v6, %v2537_v22 }
 0x1c3   : > { %1570 = vst [vmem:[%s2543_s26 + $0x1e8] sm:$0xff] %v1474_v34  ;;  %v1476_v44 = vmax.f32 %v1380_v35, 0.0  ;;  %v1381_v45 = vadd.f32 %v1285_v21, %v944_v36  ;;  %v948_v46 = vadd.f32 %v947_v39, %v2551_v55  ;;  %v1928_v17 = vpop.f32.mrf.mxu1  ;;  %v1297_v35 = vunpack.c.h.bf16 %v1207_v12 }
 0x1c4   : > { %v949_v48 = vpop.f32.mrf.mxu0  ;;  %1592 = vst [vmem:[%s2543_s26 + $0x298] sm:$0xff] %v1496_v13  ;;  %v1929_v23 = vadd.f32 %v1928_v17, %v1927_v8  ;;  %v1403_v26 = vadd.f32 %v1307_v7, %v1143_v16  ;;  %v1303_v8 = vunpack.c.h.bf16 %v1211_v50 }
 0x1c5   : > { %1572 = vst [vmem:[%s2543_s26 + $0x1f8] sm:$0xff] %v1476_v44  ;;  %v1477_v52 = vmax.f32 %v1381_v45, 0.0  ;;  %v1383_v53 = vadd.f32 %v1287_v30, %v948_v46  ;;  %v950_v54 = vadd.f32 %v949_v48, %v2554_v61  ;;  %v1930_v27 = vpop.f32.mrf.mxu1  ;;  %v1313_v45 = vunpack.c.l.bf16 %v1218_v33 }
 0x1c6   : > { %v951_v59 = vpop.f32.mrf.mxu0  ;;  %v1146_v32 = vadd.f32 %v1929_v23, %v2537_v22  ;;  %v1499_v36 = vmax.f32 %v1403_v26, 0.0 }
 0x1c7   : > { %1573 = vst [vmem:[%s2543_s26 + $0x200] sm:$0xff] %v1477_v52  ;;  %v1479_v0 = vmax.f32 %v1383_v53, 0.0  ;;  %v1384_v1 = vadd.f32 %v1288_v40, %v950_v54  ;;  %v952_v2 = vadd.f32 %v951_v59, %v2551_v55  ;;  %v1931_v37 = vpop.f32.mrf.mxu1  ;;  %v1300_v53 = vunpack.c.h.bf16 %v1209_v31 }
 0x1c8   : > { %v953_v4 = vpop.f32.mrf.mxu0  ;;  %v1406_v41 = vadd.f32 %v1310_v18, %v1146_v32  ;;  %1595 = vst [vmem:[%s2543_s26 + $0x2b0] sm:$0xff] %v1499_v36  ;;  %v1932_v44 = vadd.f32 %v1931_v37, %v1930_v27  ;;  %v1217_v32 = vld [vmem:[%s2495_s24 + $0x168] sm:$0xff] }
 0x1c9   : > { %1575 = vst [vmem:[%s2543_s26 + $0x210] sm:$0xff] %v1479_v0  ;;  %v1480_v9 = vmax.f32 %v1384_v1, 0.0  ;;  %v1386_v10 = vadd.f32 %v1290_v49, %v952_v2  ;;  %v954_v11 = vadd.f32 %v953_v4, %v2554_v61  ;;  %v1933_v46 = vpop.f32.mrf.mxu1  ;;  %v1302_v0 = vunpack.c.l.bf16 %v1211_v50 }
 0x1ca   : > { %v957_v14 = vpop.f32.mrf.mxu0  ;;  %v1502_v51 = vmax.f32 %v1406_v41, 0.0  ;;  %v1151_v54 = vadd.f32 %v1932_v44, %v2537_v22  ;;  %v1311_v41 = vunpack.c.l.bf16 %v1217_v32 }
 0x1cb   : > { %1576 = vst [vmem:[%s2543_s26 + $0x218] sm:$0xff] %v1480_v9  ;;  %v1482_v19 = vmax.f32 %v1386_v10, 0.0  ;;  %v1387_v20 = vadd.f32 %v1291_v60, %v954_v11  ;;  %v958_v21 = vadd.f32 %v957_v14, %v2551_v55  ;;  %v1934_v56 = vpop.f32.mrf.mxu1 }
 0x1cc   : > { %v959_v24 = vpop.f32.mrf.mxu0  ;;  %1598 = vst [vmem:[%s2543_s26 + $0x2c8] sm:$0xff] %v1502_v51  ;;  %v1935_v62 = vadd.f32 %v1934_v56, %v1933_v46  ;;  %v1409_v1 = vadd.f32 %v1313_v45, %v1151_v54 }
 0x1cd   : > { %1578 = vst [vmem:[%s2543_s26 + $0x228] sm:$0xff] %v1482_v19  ;;  %v1483_v28 = vmax.f32 %v1387_v20, 0.0  ;;  %v1389_v29 = vadd.f32 %v1293_v5, %v958_v21  ;;  %v960_v30 = vadd.f32 %v959_v24, %v2554_v61  ;;  %v1213_v5 = vld [vmem:[%s2495_s24 + $0x150] sm:$0xff]  ;;  %v1215_v20 = vld [vmem:[%s2495_s24 + $0x15c] sm:$0xff] }
 0x1ce   : > { %v961_v34 = vpop.f32.mrf.mxu0  ;;  %v1154_v6 = vadd.f32 %v1935_v62, %v2537_v22  ;;  %v1505_v9 = vmax.f32 %v1409_v1, 0.0  ;;  %v1309_v36 = vunpack.c.h.bf16 %v1215_v20 }
 0x1cf   : > { %1579 = vst [vmem:[%s2543_s26 + $0x230] sm:$0xff] %v1483_v28  ;;  %v1485_v38 = vmax.f32 %v1389_v29, 0.0  ;;  %v1390_v39 = vadd.f32 %v1294_v15, %v960_v30  ;;  %v962_v40 = vadd.f32 %v961_v34, %v2551_v55  ;;  %v1305_v15 = vunpack.c.l.bf16 %v1213_v5 }
 0x1d0   : > { %v963_v42 = vpop.f32.mrf.mxu0  ;;  %v1412_v13 = vadd.f32 %v1316_v57, %v1154_v6  ;;  %1601 = vst [vmem:[%s2543_s26 + $0x2e0] sm:$0xff] %v1505_v9  ;;  %v1308_v30 = vunpack.c.l.bf16 %v1215_v20 }
 0x1d1   : > { %1581 = vst [vmem:[%s2543_s26 + $0x240] sm:$0xff] %v1485_v38  ;;  %v1486_v47 = vmax.f32 %v1390_v39, 0.0  ;;  %v1392_v48 = vadd.f32 %v1296_v25, %v962_v40  ;;  %v964_v49 = vadd.f32 %v963_v42, %v2554_v61  ;;  %v1306_v25 = vunpack.c.h.bf16 %v1213_v5 }
 0x1d2   : > { %v967_v52 = vpop.f32.mrf.mxu0  ;;  %v1508_v18 = vmax.f32 %v1412_v13, 0.0 }
 0x1d3   : > { %1582 = vst [vmem:[%s2543_s26 + $0x248] sm:$0xff] %v1486_v47  ;;  %v1488_v58 = vmax.f32 %v1392_v48, 0.0  ;;  %v1393_v59 = vadd.f32 %v1297_v35, %v964_v49  ;;  %v968_v60 = vadd.f32 %v967_v52, %v2551_v55  ;;  %v1312_v47 = vunpack.c.h.bf16 %v1217_v32 }
 0x1d4   : > { %v969_v63 = vpop.f32.mrf.mxu0  ;;  %1604 = vst [vmem:[%s2543_s26 + $0x2f8] sm:$0xff] %v1508_v18 }
 0x1d5   : > { %1584 = vst [vmem:[%s2543_s26 + $0x258] sm:$0xff] %v1488_v58  ;;  %v1489_v2 = vmax.f32 %v1393_v59, 0.0  ;;  %v1395_v3 = vadd.f32 %v1299_v43, %v968_v60  ;;  %v970_v4 = vadd.f32 %v969_v63, %v2554_v61  ;;  %v1219_v43 = vld [vmem:[%s2495_s24 + $0x174] sm:$0xff] }
 0x1d6   : > { %v971_v7 = vpop.f32.mrf.mxu0  ;;  %v1314_v52 = vunpack.c.l.bf16 %v1219_v43  ;;  %v1315_v58 = vunpack.c.h.bf16 %v1219_v43 }
 0x1d7   : > { %1585 = vst [vmem:[%s2543_s26 + $0x260] sm:$0xff] %v1489_v2  ;;  %v1491_v10 = vmax.f32 %v1395_v3, 0.0  ;;  %v1396_v11 = vadd.f32 %v1300_v53, %v970_v4  ;;  %v972_v12 = vadd.f32 %v971_v7, %v2551_v55 }
 0x1d8   : > { %v973_v14 = vpop.f32.mrf.mxu0 }
 0x1d9   : > { %1587 = vst [vmem:[%s2543_s26 + $0x270] sm:$0xff] %v1491_v10  ;;  %v1492_v16 = vmax.f32 %v1396_v11, 0.0  ;;  %v1398_v17 = vadd.f32 %v1302_v0, %v972_v12  ;;  %v974_v22 = vadd.f32 %v973_v14, %v2554_v61 }
 0x1da   : > { %v977_v19 = vpop.f32.mrf.mxu0 }
 0x1db   : > { %1588 = vst [vmem:[%s2543_s26 + $0x278] sm:$0xff] %v1492_v16  ;;  %v1494_v21 = vmax.f32 %v1398_v17, 0.0  ;;  %v1399_v23 = vadd.f32 %v1303_v8, %v974_v22  ;;  %v978_v24 = vadd.f32 %v977_v19, %v2551_v55 }
 0x1dc   : > { %v979_v26 = vpop.f32.mrf.mxu0 }
 0x1dd   : > { %1590 = vst [vmem:[%s2543_s26 + $0x288] sm:$0xff] %v1494_v21  ;;  %v1495_v27 = vmax.f32 %v1399_v23, 0.0  ;;  %v1401_v28 = vadd.f32 %v1305_v15, %v978_v24  ;;  %v980_v29 = vadd.f32 %v979_v26, %v2554_v61 }
 0x1de   : > { %v981_v31 = vpop.f32.mrf.mxu0 }
 0x1df   : > { %1591 = vst [vmem:[%s2543_s26 + $0x290] sm:$0xff] %v1495_v27  ;;  %v1497_v33 = vmax.f32 %v1401_v28, 0.0  ;;  %v1402_v34 = vadd.f32 %v1306_v25, %v980_v29  ;;  %v982_v35 = vadd.f32 %v981_v31, %v2551_v55 }
 0x1e0   : > { %v983_v37 = vpop.f32.mrf.mxu0 }
 0x1e1   : > { %1593 = vst [vmem:[%s2543_s26 + $0x2a0] sm:$0xff] %v1497_v33  ;;  %v1498_v38 = vmax.f32 %v1402_v34, 0.0  ;;  %v1404_v39 = vadd.f32 %v1308_v30, %v982_v35  ;;  %v984_v40 = vadd.f32 %v983_v37, %v2554_v61 }
 0x1e2   : > { %v987_v42 = vpop.f32.mrf.mxu0 }
 0x1e3   : > { %1594 = vst [vmem:[%s2543_s26 + $0x2a8] sm:$0xff] %v1498_v38  ;;  %v1500_v44 = vmax.f32 %v1404_v39, 0.0  ;;  %v1405_v45 = vadd.f32 %v1309_v36, %v984_v40  ;;  %v988_v46 = vadd.f32 %v987_v42, %v2551_v55 }
 0x1e4   : > { %v989_v48 = vpop.f32.mrf.mxu0 }
 0x1e5   : > { %1596 = vst [vmem:[%s2543_s26 + $0x2b8] sm:$0xff] %v1500_v44  ;;  %v1501_v49 = vmax.f32 %v1405_v45, 0.0  ;;  %v1407_v50 = vadd.f32 %v1311_v41, %v988_v46  ;;  %v990_v51 = vadd.f32 %v989_v48, %v2554_v61 }
 0x1e6   : > { %v991_v53 = vpop.f32.mrf.mxu0 }
 0x1e7   : > { %1597 = vst [vmem:[%s2543_s26 + $0x2c0] sm:$0xff] %v1501_v49  ;;  %v1503_v54 = vmax.f32 %v1407_v50, 0.0  ;;  %v1408_v56 = vadd.f32 %v1312_v47, %v990_v51  ;;  %v992_v57 = vadd.f32 %v991_v53, %v2551_v55 }
 0x1e8   : > { %v993_v59 = vpop.f32.mrf.mxu0 }
 0x1e9   : > { %1599 = vst [vmem:[%s2543_s26 + $0x2d0] sm:$0xff] %v1503_v54  ;;  %v1504_v60 = vmax.f32 %v1408_v56, 0.0  ;;  %v1410_v62 = vadd.f32 %v1314_v52, %v992_v57  ;;  %v994_v63 = vadd.f32 %v993_v59, %v2554_v61 }
 0x1eb   : > { %1600 = vst [vmem:[%s2543_s26 + $0x2d8] sm:$0xff] %v1504_v60  ;;  %v1506_v0 = vmax.f32 %v1410_v62, 0.0  ;;  %v1411_v1 = vadd.f32 %v1315_v58, %v994_v63 }
 0x1ed   : > { %1602 = vst [vmem:[%s2543_s26 + $0x2e8] sm:$0xff] %v1506_v0  ;;  %v1507_v55 = vmax.f32 %v1411_v1, 0.0 }
 0x1ef   : > { %1603 = vst [vmem:[%s2543_s26 + $0x2f0] sm:$0xff] %v1507_v55 }
 0x1f0   : > { %2216 = shalt.err (!%p2213_p3)
}
 0x1f1   : > { %s2217_s20 = scalar_lea.hbm %s2788_s14, 12288  ;;  %s2221_s24 = scalar_lea.hbm %s2839_s4, 24576 }
 0x1f2   : > { %p2218_p8 = scmp.ne.s32.totalorder %s2788_s14, %s2217_s20  ;;  %p2222_p1 = scmp.lt.s32.totalorder %s2788_s14, %s2839_s4 }
 0x1f3   : > { %p2223_p6 = scmp.lt.s32.totalorder %s2221_s24, %s2217_s20 }
 0x1f4   : > { %p2219_p10 = pnand %p2218_p8, %p2857_p9 }
 0x1f5   : > { %p2224_p4 = por %p2223_p6, %p2222_p1 }
 0x1f6   : > { %p2220_p13 = pneg %p2219_p10 }
 0x1f8   : > { %p2225_p5 = pnand %p2224_p4, %p2220_p13 }
 0x1fa   : > { %2228 = shalt.err (!%p2225_p5)
}
 0x1fb   : > { %s2285_s23 = smov 384   ;;  %s2286_s26 = smov 24  }
 0x1fc   : > { %1949 = dma.vmem_to_hbm [thread:$0]  (%p2857_p9), %s2790_s21, 12288, %s2788_s14, %s1606_s27, %s2285_s23, %s2285_s23, %s2286_s26  }
 0x1fd PF: > { %s1635_s28 = sand.u32 1, %s2263_s15   ;;  %p2858_p12 = scmp.ne.s32.totalorder %s2849_s5, 0 }
 0x1fe   : > { %p2859_p2 = scmp.ge.s32.totalorder %s2275_s18, 2  ;;  %s1636_s25 = scalar_lea.sflag [#allocation4], %s1635_s28 }
 0x200   : > { %p1963_p7 = pnand %p2859_p2, %p2858_p12 }
 0x202   : > { %p1964_p11 = pneg %p1963_p7 }
 0x204   : > { %2258 = dma.done.wait (%p1964_p11), %s1636_s25, 12288  }
 0x205   : > { %2260 = vsyncadd (%p1964_p11), %s1636_s25, 4294955008  ;;  %p18_p0 = scmp.ge.s32.totalorder %s2333_s19, 4   ;;  %s2860_s15 = smov %s2267_s16 }
 0x206   : > { %s2861_s16 = smov %s2271_s17  ;;  %s2862_s17 = smov %s2344_s22 }
 0x207   : > { %s2863_s18 = smov %s2333_s19  ;;  %20 = sbr.rel (!%p18_p0) target bundleno = 8 (0x8), region = 96 }
 0x20c   :  { %1641 = vsyncpa [#allocation3], 1 }
 0x20d   :  { %1643 = vsyncpa [#allocation3 + $0x1], 1 }
 0x20e   :  { %1644 = vsyncpa [#allocation6], 1 }
 0x20f   :  { %1645 = vsyncpa [#allocation4], 1 }
 0x210   :  { %1647 = vsyncpa [#allocation4 + $0x1], 1 }

</bundles_post_ra>
